<compile_context>
chip_gen: v7x
topology: tpu7x:2x2x1
jax: 0.10.0
libtpu: 0.0.40
codegen_flags: <defaults>
</compile_context>

<pallas_src>
import jax
import jax.numpy as jnp
import numpy as np
from jax.experimental import pallas as pl
from jax.experimental.pallas import tpu as pltpu


def uv_agg_kernel(r_ref, e_uv_ref, r_contrib_ref, w1t_ref, w2t_ref, b2_ref, out_ref):
    """One grid step: BN nodes x L history rows.

    r_ref        : (BN*L, 1)  int32 ratings (1-based), pre-flattened in the wrapper
    e_uv_ref     : (BN*L, D)  pre-gathered item/user embeddings, bf16
    r_contrib_ref: (R_pad, Dp) bf16, precomputed r2e @ W1_rhalf^T + b1 (zero-padded)
    w1t_ref      : (D, Dp)    bf16, item half of W1, transposed, lane-padded
    w2t_ref      : (Dp, Dp)   bf16, W2 transposed, lane-padded
    b2_ref       : (1, Dp)    f32
    out_ref      : (BN, Dp)   f32
    """
    M = r_ref.shape[0]
    R_pad, Dp = r_contrib_ref.shape
    BN = out_ref.shape[0]
    L = M // BN

    # ---- first Linear, item half (bf16 MXU, f32 accumulate): (M, D) @ (D, Dp) ----
    h = jnp.dot(e_uv_ref[...], w1t_ref[...], preferred_element_type=jnp.float32)

    # ---- rating contribution: tiny one-hot lookup against the precomputed table.
    # r2e @ W1_rhalf^T + b1 was folded into r_contrib in the wrapper, so this adds
    # both the rating half of the first Linear and its bias in one K=R_pad matmul.
    r_idx = r_ref[...] - 1                                       # (M, 1); PyTorch: [i - 1 for i in tmp_label]
    rate_ids = jax.lax.broadcasted_iota(jnp.int32, (M, R_pad), 1)
    onehot_r = (r_idx == rate_ids).astype(jnp.bfloat16)          # (M, R_pad)
    h = h + jnp.dot(onehot_r, r_contrib_ref[...], preferred_element_type=jnp.float32)
    h = jnp.maximum(h, 0.0)                                      # (M, Dp) f32

    # ---- second Linear + ReLU (bf16 MXU, f32 accumulate) ----
    # TODO(synk): K is padded D -> Dp here; when D is a multiple of 128 build w2t as
    #             (D, Dp) with no K padding to drop the wasted MXU pushes (only
    #             visible once the kernel stops being DMA/overhead-bound).
    o = jnp.dot(h.astype(jnp.bfloat16), w2t_ref[...],
                preferred_element_type=jnp.float32) + b2_ref[...]
    o = jnp.maximum(o, 0.0)                                      # (M, Dp)

    # ---- mean over each node's L history rows: pure-view reshape + sublane reduce
    #      (L kept a multiple of 8 by the caller so this stays a clean XLU reduce).
    out_ref[...] = o.reshape(BN, L, Dp).sum(axis=1) * (1.0 / L)  # (BN, Dp)


def uv_aggregator(history_uv, history_r, v2e, r2e, w1, b1, w2, b2, *, block_nodes=512):
    """history_uv/history_r: int32 [N, L]; v2e: [num_items, D]; r2e: [num_ratings, D];
    w1: [D, 2D], b1: [D]; w2: [D, D], b2: [D]  (PyTorch nn.Linear layout)."""
    history_uv = jnp.asarray(history_uv, jnp.int32)
    history_r = jnp.asarray(history_r, jnp.int32)
    v2e = jnp.asarray(v2e, jnp.float32)
    r2e = jnp.asarray(r2e, jnp.float32)
    w1 = jnp.asarray(w1, jnp.float32)
    b1 = jnp.asarray(b1, jnp.float32)
    w2 = jnp.asarray(w2, jnp.float32)
    b2 = jnp.asarray(b2, jnp.float32)

    N, L = history_uv.shape
    D = v2e.shape[1]
    num_ratings = r2e.shape[0]

    Dp = ((D + 127) // 128) * 128                  # lane-dense output width
    R_pad = max(8, ((num_ratings + 7) // 8) * 8)   # pad rating table to 8 sublanes

    # --- wrapper-side embedding gather (table stays in HBM, handled by XLA).
    #     Gathering from a bf16 copy halves both the gather traffic and the
    #     kernel's dominant e_uv DMA stream.
    e_uv = v2e.astype(jnp.bfloat16)[history_uv]    # (N, L, D) bf16

    # --- precompute / pad weights so the kernel is lane-dense everywhere ---
    # first Linear split: x @ W1^T = e_uv @ W1[:, :D]^T + e_r @ W1[:, D:]^T + b1
    w1t_top = (jnp.zeros((D, Dp), jnp.float32)
               .at[:, :D].set(w1[:, :D].T).astype(jnp.bfloat16))
    r_contrib = (jnp.zeros((R_pad, Dp), jnp.float32)
                 .at[:num_ratings, :D].set(r2e @ w1[:, D:].T + b1[None, :])
                 .astype(jnp.bfloat16))
    w2t_pad = (jnp.zeros((Dp, Dp), jnp.float32)
               .at[:D, :D].set(w2.T).astype(jnp.bfloat16))
    b2_pad = jnp.zeros((1, Dp), jnp.float32).at[:, :D].set(b2[None, :])

    # --- pick the node block: as large as possible (amortize per-step overhead),
    #     but keep the grid length >= 2 so v7x's two TensorCores both get work.
    bn = max(8, min(block_nodes, ((N + 7) // 8) * 8))
    if N > 8:
        bn = min(bn, max(8, ((pl.cdiv(N, 2) + 7) // 8) * 8))
    Np = ((N + bn - 1) // bn) * bn
    pad = Np - N

    # --- wrapper-side flatten of ratings: free metadata reshape, avoids the
    #     in-kernel lane->sublane relayout of the previous version.
    e_uv_flat = e_uv.reshape(N * L, D)
    r_flat = history_r.reshape(N * L, 1)
    if pad:
        e_uv_flat = jnp.pad(e_uv_flat, ((0, pad * L), (0, 0)))
        r_flat = jnp.pad(r_flat, ((0, pad * L), (0, 0)), constant_values=1)

    grid = (Np // bn,)
    full = lambda i: (0, 0)

    # Scoped-VMEM estimate (double-buffered ins/outs + weight copies). Only override
    # the default limit when the blocks actually need it (matters on v5e's 16 MiB
    # default); cap below v7x's 64 MiB physical VMEM.
    est_vmem = (2 * bn * L * (2 * D + 4)                         # e_uv bf16 + r int32
                + 2 * bn * Dp * 4                                # output f32
                + 2 * 2 * (R_pad * Dp + D * Dp + Dp * Dp)        # bf16 weight tables
                + 2 * 4 * Dp)                                    # b2 f32
    vmem_limit = None
    if est_vmem > 16 * 1024 * 1024:
        vmem_limit = min(2 * est_vmem, 56 * 1024 * 1024)

    out = pl.pallas_call(
        uv_agg_kernel,
        out_shape=jax.ShapeDtypeStruct((Np, Dp), jnp.float32),
        grid=grid,
        in_specs=[
            pl.BlockSpec((bn * L, 1), lambda i: (i, 0)),    # ratings, pre-flattened
            pl.BlockSpec((bn * L, D), lambda i: (i, 0)),    # gathered e_uv rows (bf16)
            # TODO(synk): mark the four constant-index operands below as
            #             pipeline_mode=pl.Buffered(1) before scaling D up on v7x
            #             (default double-buffering duplicates each weight in VMEM).
            pl.BlockSpec((R_pad, Dp), full),                # rating contribution table
            pl.BlockSpec((D, Dp), full),                    # W1_top^T (padded)
            pl.BlockSpec((Dp, Dp), full),                   # W2^T (padded)
            pl.BlockSpec((1, Dp), full),                    # b2 (padded)
        ],
        out_specs=pl.BlockSpec((bn, Dp), lambda i: (i, 0)),
        compiler_params=pltpu.CompilerParams(
            dimension_semantics=("parallel",),
            vmem_limit_bytes=vmem_limit),
    )(r_flat, e_uv_flat, r_contrib, w1t_top, w2t_pad, b2_pad)

    if pad == 0 and Dp == D:
        return out                                  # already dense; skip the trailing copy
    return out[:N, :D]


def uv_aggregator_ref(history_uv, history_r, v2e, r2e, w1, b1, w2, b2):
    """Pure-JAX f32 reference mirroring the PyTorch forward."""
    e_uv = v2e[history_uv]                         # (N, L, D)
    e_r = r2e[history_r - 1]                       # (N, L, D)
    x = jnp.concatenate([e_uv, e_r], axis=-1)      # (N, L, 2D)
    h = jax.nn.relu(jnp.einsum('nlk,dk->nld', x, w1) + b1)
    o = jax.nn.relu(jnp.einsum('nld,ed->nle', h, w2) + b2)
    return jnp.mean(o, axis=1)                     # (N, D)


if __name__ == "__main__":
    # Small, deterministic shapes (N sized so the grid has >= 2 steps).
    N = 128           # number of nodes (len(history_uv))
    L = 8             # fixed history length per node (multiple of 8)
    D = 32            # embed_dim
    NUM_ITEMS = 40    # v2e / u2e table rows
    NUM_RATINGS = 5   # r2e table rows (ratings 1..5)

    key = jax.random.PRNGKey(0)
    k_uv, k_r, k_v2e, k_r2e, k_w1, k_b1, k_w2, k_b2 = jax.random.split(key, 8)

    history_uv = jax.random.randint(k_uv, (N, L), 0, NUM_ITEMS, dtype=jnp.int32)
    history_r = jax.random.randint(k_r, (N, L), 1, NUM_RATINGS + 1, dtype=jnp.int32)

    v2e = jax.random.normal(k_v2e, (NUM_ITEMS, D), dtype=jnp.float32)
    r2e = jax.random.normal(k_r2e, (NUM_RATINGS, D), dtype=jnp.float32)

    # nn.Linear(embed_dim*2, embed_dim) -> weight (D, 2D), bias (D)
    w1 = 0.1 * jax.random.normal(k_w1, (D, 2 * D), dtype=jnp.float32)
    b1 = 0.1 * jax.random.normal(k_b1, (D,), dtype=jnp.float32)
    # nn.Linear(embed_dim, embed_dim) -> weight (D, D), bias (D)
    w2 = 0.1 * jax.random.normal(k_w2, (D, D), dtype=jnp.float32)
    b2 = 0.1 * jax.random.normal(k_b2, (D,), dtype=jnp.float32)

    out = uv_aggregator(history_uv, history_r, v2e, r2e, w1, b1, w2, b2)
    out = jax.block_until_ready(out)

    ref = uv_aggregator_ref(history_uv, history_r, v2e, r2e, w1, b1, w2, b2)
    # bf16 MXU operands (f32 accumulate) -> tolerance loosened vs. the pure-f32 check.
    np.testing.assert_allclose(np.asarray(out), np.asarray(ref), rtol=2e-2, atol=2e-2)

    print("KERNEL_OK")
</pallas_src>

<mosaic_0001>
module attributes {stable_mosaic.version = 11 : i64} {
  func.func @uv_agg_kernel(%arg0: i32, %arg1: memref<512x1xi32, #tpu.memory_space<vmem>>, %arg2: memref<512x32xbf16, #tpu.memory_space<vmem>>, %arg3: memref<8x128xbf16, #tpu.memory_space<vmem>>, %arg4: memref<32x128xbf16, #tpu.memory_space<vmem>>, %arg5: memref<128x128xbf16, #tpu.memory_space<vmem>>, %arg6: memref<1x128xf32, #tpu.memory_space<vmem>>, %arg7: memref<64x128xf32, #tpu.memory_space<vmem>>) attributes {dimension_semantics = [#tpu.dimension_semantics<parallel>], iteration_bounds = array<i64: 2>, scalar_prefetch = 0 : i64, scratch_operands = 0 : i64, tpu.core_type = #tpu.core_type<tc>, window_params = [{transform_indices = @transform_0, window_bounds = array<i64: 512, 1>}, {transform_indices = @transform_1, window_bounds = array<i64: 512, 32>}, {pipeline_mode = #tpu.pipeline_mode<synchronous>, transform_indices = @transform_2, window_bounds = array<i64: 8, 128>}, {pipeline_mode = #tpu.pipeline_mode<synchronous>, transform_indices = @transform_3, window_bounds = array<i64: 32, 128>}, {pipeline_mode = #tpu.pipeline_mode<synchronous>, transform_indices = @transform_4, window_bounds = array<i64: 128, 128>}, {pipeline_mode = #tpu.pipeline_mode<synchronous>, transform_indices = @transform_5, window_bounds = array<i64: 1, 128>}, {transform_indices = @transform_6, window_bounds = array<i64: 64, 128>}]} {
    %c0 = arith.constant 0 : index
    %c0_0 = arith.constant 0 : index
    %0 = vector.load %arg2[%c0, %c0_0] : memref<512x32xbf16, #tpu.memory_space<vmem>>, vector<512x32xbf16>
    %c0_1 = arith.constant 0 : index
    %c0_2 = arith.constant 0 : index
    %1 = vector.load %arg4[%c0_1, %c0_2] : memref<32x128xbf16, #tpu.memory_space<vmem>>, vector<32x128xbf16>
    %cst = arith.constant dense<0.000000e+00> : vector<512x128xf32>
    %2 = tpu.matmul %0, %1, %cst {dimension_numbers = #tpu.dot_dimension_numbers<[1], [0], [0], [1], [0, 0, 1, 1], [], []>} : vector<512x32xbf16>, vector<32x128xbf16>, vector<512x128xf32> -> vector<512x128xf32>
    %c0_3 = arith.constant 0 : index
    %c0_4 = arith.constant 0 : index
    %3 = vector.load %arg1[%c0_3, %c0_4] : memref<512x1xi32, #tpu.memory_space<vmem>>, vector<512x1xi32>
    %c1_i32 = arith.constant 1 : i32
    %4 = vector.broadcast %c1_i32 : i32 to vector<512x1xi32>
    %5 = arith.subi %3, %4 : vector<512x1xi32>
    %6 = tpu.iota {dimensions = array<i32: 1>} : vector<512x8xi32>
    %7 = vector.broadcast %5 : vector<512x1xi32> to vector<512x8xi32>
    %8 = arith.cmpi eq, %7, %6 : vector<512x8xi32>
    %9 = arith.extui %8 : vector<512x8xi1> to vector<512x8xi32>
    %10 = arith.sitofp %9 : vector<512x8xi32> to vector<512x8xf32>
    %11 = arith.truncf %10 : vector<512x8xf32> to vector<512x8xbf16>
    %c0_5 = arith.constant 0 : index
    %c0_6 = arith.constant 0 : index
    %12 = vector.load %arg3[%c0_5, %c0_6] : memref<8x128xbf16, #tpu.memory_space<vmem>>, vector<8x128xbf16>
    %cst_7 = arith.constant dense<0.000000e+00> : vector<512x128xf32>
    %13 = tpu.matmul %11, %12, %cst_7 {dimension_numbers = #tpu.dot_dimension_numbers<[1], [0], [0], [1], [0, 0, 1, 1], [], []>} : vector<512x8xbf16>, vector<8x128xbf16>, vector<512x128xf32> -> vector<512x128xf32>
    %14 = arith.addf %2, %13 : vector<512x128xf32>
    %cst_8 = arith.constant 0.000000e+00 : f32
    %15 = vector.broadcast %cst_8 : f32 to vector<512x128xf32>
    %16 = arith.maximumf %14, %15 : vector<512x128xf32>
    %17 = arith.truncf %16 : vector<512x128xf32> to vector<512x128xbf16>
    %c0_9 = arith.constant 0 : index
    %c0_10 = arith.constant 0 : index
    %18 = vector.load %arg5[%c0_9, %c0_10] : memref<128x128xbf16, #tpu.memory_space<vmem>>, vector<128x128xbf16>
    %cst_11 = arith.constant dense<0.000000e+00> : vector<512x128xf32>
    %19 = tpu.matmul %17, %18, %cst_11 {dimension_numbers = #tpu.dot_dimension_numbers<[1], [0], [0], [1], [0, 0, 1, 1], [], []>} : vector<512x128xbf16>, vector<128x128xbf16>, vector<512x128xf32> -> vector<512x128xf32>
    %c0_12 = arith.constant 0 : index
    %c0_13 = arith.constant 0 : index
    %20 = vector.load %arg6[%c0_12, %c0_13] : memref<1x128xf32, #tpu.memory_space<vmem>>, vector<1x128xf32>
    %21 = vector.broadcast %20 : vector<1x128xf32> to vector<512x128xf32>
    %22 = arith.addf %19, %21 : vector<512x128xf32>
    %cst_14 = arith.constant 0.000000e+00 : f32
    %23 = vector.broadcast %cst_14 : f32 to vector<512x128xf32>
    %24 = arith.maximumf %22, %23 : vector<512x128xf32>
    %25 = vector.shape_cast %24 : vector<512x128xf32> to vector<64x8x128xf32>
    %cst_15 = arith.constant dense<0.000000e+00> : vector<64x128xf32>
    %26 = vector.multi_reduction <add>, %25, %cst_15 [1] : vector<64x8x128xf32> to vector<64x128xf32>
    %cst_16 = arith.constant 1.250000e-01 : f32
    %27 = vector.broadcast %cst_16 : f32 to vector<64x128xf32>
    %28 = arith.mulf %26, %27 : vector<64x128xf32>
    %c0_17 = arith.constant 0 : index
    %c0_18 = arith.constant 0 : index
    %29 = vector.load %arg7[%c0_17, %c0_18] : memref<64x128xf32, #tpu.memory_space<vmem>>, vector<64x128xf32>
    tpu.vector_store %arg7[%c0_17, %c0_18], %28 {strides = array<i32>} : memref<64x128xf32, #tpu.memory_space<vmem>>, vector<64x128xf32>,
    return
  }
  func.func @transform_0(%arg0: i32) -> (i32, i32) {
    %c0_i32 = arith.constant 0 : i32
    %c0_i32_0 = arith.constant 0 : i32
    return %arg0, %c0_i32 : i32, i32
  }
  func.func @transform_1(%arg0: i32) -> (i32, i32) {
    %c0_i32 = arith.constant 0 : i32
    %c0_i32_0 = arith.constant 0 : i32
    return %arg0, %c0_i32 : i32, i32
  }
  func.func @transform_2(%arg0: i32) -> (i32, i32) {
    %c0_i32 = arith.constant 0 : i32
    %c0_i32_0 = arith.constant 0 : i32
    %c0_i32_1 = arith.constant 0 : i32
    return %c0_i32, %c0_i32_0 : i32, i32
  }
  func.func @transform_3(%arg0: i32) -> (i32, i32) {
    %c0_i32 = arith.constant 0 : i32
    %c0_i32_0 = arith.constant 0 : i32
    %c0_i32_1 = arith.constant 0 : i32
    return %c0_i32, %c0_i32_0 : i32, i32
  }
  func.func @transform_4(%arg0: i32) -> (i32, i32) {
    %c0_i32 = arith.constant 0 : i32
    %c0_i32_0 = arith.constant 0 : i32
    %c0_i32_1 = arith.constant 0 : i32
    return %c0_i32, %c0_i32_0 : i32, i32
  }
  func.func @transform_5(%arg0: i32) -> (i32, i32) {
    %c0_i32 = arith.constant 0 : i32
    %c0_i32_0 = arith.constant 0 : i32
    %c0_i32_1 = arith.constant 0 : i32
    return %c0_i32, %c0_i32_0 : i32, i32
  }
  func.func @transform_6(%arg0: i32) -> (i32, i32) {
    %c0_i32 = arith.constant 0 : i32
    %c0_i32_0 = arith.constant 0 : i32
    return %arg0, %c0_i32 : i32, i32
  }
}

</mosaic_0001>

<bundles_post_ra>
// kernel: tpu_custom_call.1
= control target key start
LH: loop header
LB: loop body
LE: loop exit
PB: predicated region body
PF: predicated region fallthrough
CT: control target
= control target key end

     0   :  { %11 = vsyncpa [#allocation3], 0  ;;  %s4637_s0 = inlined_call_operand.vmem [shape: s32[1024,1], index: 0, kind: input, shape index: {}]   ;;  %s4638_s1 = inlined_call_operand.vmem [shape: bf16[1024,32], index: 1, kind: input, shape index: {}]   ;;  %s4639_s2 = inlined_call_operand.vmem [shape: bf16[8,128], index: 2, kind: input, shape index: {}]   ;;  %s4640_s3 = inlined_call_operand.vmem [shape: bf16[32,128], index: 3, kind: input, shape index: {}]   ;;  %s4641_s4 = inlined_call_operand.vmem [shape: bf16[128,128], index: 4, kind: input, shape index: {}]   ;;  %s4642_s5 = inlined_call_operand.vmem [shape: f32[1,128], index: 5, kind: input, shape index: {}]   ;;  %s4643_s6 = inlined_call_operand.hbm [shape: f32[128,128], index: 6, kind: output, shape index: {}]  }
   0x1   :  { %13 = vsyncpa [#allocation3 + $0x1], 0  ;;  %s3869_s21 = smov 0   ;;  %s3871_s22 = smov 0  }
   0x2   :  { %s3873_s23 = smov 0   ;;  %s3875_s24 = smov 0  }
   0x3 LB: > { %s3890_s25 = sadd.s32 4294967295, %s3827_s24   ;;  %s3038_s26 = sadd.s32 4294967294, %s3827_s24   ;;  %s3827_s24 = sphi %s3875_s24, %s4649_s24   ;;  %s3823_s23 = sphi %s3873_s23, %s4648_s23   ;;  %s3819_s22 = sphi %s3871_s22, %s4647_s22   ;;  %s3815_s21 = sphi %s3869_s21, %s4646_s21  }
   0x4   : > { %s3894_s27 = sadd.s32 1, %s3827_s24   ;;  %s162_s28 = sadd.s32 1, %s3823_s23 }
   0x5   : > { %s159_s29 = ssub.s32 %s3827_s24, %s3894_s27  ;;  %p172_p0 = scmp.ne.s32.totalorder %s3823_s23, %s3819_s22 }
   0x6   : > { %p160_p1 = scmp.eq.s32.totalorder %s159_s29, 0  ;;  %p173_p2 = scmp.eq.s32.totalorder %s3890_s25, 1 }
   0x7   : > { %p178_p3 = scmp.ne.s32.totalorder %s3819_s22, %s3815_s21  ;;  %p179_p4 = scmp.eq.s32.totalorder %s3038_s26, 1 }
   0x8   : > { %s3905_s30 = scalar_select %p160_p1, %s3823_s23, %s162_s28  }
   0x9   : > { %p3907_p5 = por %p173_p2, %p172_p0  ;;  %p3911_p6 = por %p179_p4, %p178_p3 }
   0xa   : > { %p3041_p7 = scmp.ge.s32.totalorder %s3827_s24, 1  ;;  %p227_p8 = scmp.lt.s32.totalorder %s3827_s24, 3 }
   0xc   : > { %p228_p9 = pnand %p3041_p7, %p227_p8 }
   0xd   : > { %s3043_s9 = sshll.u32 (!%p228_p9), %s3890_s25, 6  ;;  %v3829_v0 = vmov (!%p228_p9), 0   ;;  %v890_v48 = vld [vmem:[%s4639_s2] sm:$0xf] (!%p228_p9)  ;;  %vm988_vm0 = vcmask (!%p228_p9), 1043456   ;;  %vm891_vm5 = vcmask (!%p228_p9), 64512  }
   0xe   : > { %231 = sbr.rel (%p228_p9) target bundleno = 845 (0x34d), region = 44  ;;  %3721 = vset.pattern.permute.xlu1 (!%p228_p9), %v3829_v0  ;;  %3720 = vset.pattern.permute.xlu0 (!%p228_p9), %v3829_v0  ;;  %p263_p10 = scmp.lt.s32.totalorder (!%p228_p9), %s3043_s9, 127  ;;  %v3962_v49 = vld [vmem:[%s4640_s3] sm:$0xff] (!%p228_p9)   ;;  %v990_v51 = vsel (!%p228_p9), %vm988_vm0, %v890_v48, 0 }
   0xf   : > { %3675 = vmatprep.subr.msk.bf16.mxu0 (!%p228_p9), %vm988_vm0, %v890_v48  ;;  %3676 = vmatprep.subr.msk.bf16.mxu1 (!%p228_p9), %vm988_vm0, %v890_v48  ;;  %s259_s12 = sand.u32 (!%p228_p9), 1, %s3819_s22   ;;  %s3287_s18 = sshll.u32 (!%p228_p9), %s3890_s25, 10 }
  0x10   : > { %3396 = vmatpush3.bf16.msra.mxu0 (!%p228_p9), %v990_v51  ;;  %3610 = vmatpush3.bf16.msra.mxu1 (!%p228_p9), %v990_v51  ;;  %s4587_s28 = scalar_lea.hbm (!%p228_p9), %s4643_s6, %s3287_s18  ;;  %s4596_s25 = scalar_lea.sflag (!%p228_p9), [#allocation3], %s259_s12 }
  0x11   : > { %3461 = vmatprep.subr.bf16.mxu0 (!%p228_p9), %v3962_v49 }
  0x15   : > { %s4651_s9 = smov (!%p263_p10, %s3043_s9), 127 }
  0x16   : > { %s3044_s10 = sshll.u32 %s4651_s9, 3  ;;  %s3046_s14 = sshll.u32 %s4651_s9, 2 }
  0x17   : > { %s3924_s13 = scalar_lea.vmem %s4637_s0, %s3044_s10  ;;  %s3954_s17 = scalar_lea.vmem %s4638_s1, %s3046_s14 }
  0x18   : > { %v346_v1 = vld [vmem:[%s3924_s13 + $0x10] sm:$0xff]  ;;  %v344_v2 = vld [vmem:[%s3924_s13] sm:$0xff]  ;;  %v347_v3 = vld [vmem:[%s3924_s13 + $0x18] sm:$0xff]  ;;  %s3831_s9 = smov [#allocation2]  }
  0x19   : > { %v3049_v4 = vadd.s32 4294967295, %v346_v1  ;;  %v3047_v5 = vadd.s32 4294967295, %v344_v2  ;;  %v345_v6 = vld [vmem:[%s3924_s13 + $0x8] sm:$0xff]  ;;  %v3050_v7 = vadd.s32 4294967295, %v347_v3  ;;  %v348_v10 = vld [vmem:[%s3924_s13 + $0x20] sm:$0xff]  ;;  %v351_v13 = vld [vmem:[%s3924_s13 + $0x38] sm:$0xff] }
  0x1a   : > { %v3048_v8 = vadd.s32 4294967295, %v345_v6  ;;  %v349_v9 = vld [vmem:[%s3924_s13 + $0x28] sm:$0xff]  ;;  %v3051_v12 = vadd.s32 4294967295, %v348_v10  ;;  %v350_v14 = vld [vmem:[%s3924_s13 + $0x30] sm:$0xff]  ;;  %v3054_v15 = vadd.s32 4294967295, %v351_v13  ;;  %v352_v18 = vld [vmem:[%s3924_s13 + $0x40] sm:$0xff] }
  0x1b   : > { %481 = vperm.xlu1 %3721, %v3049_v4   ;;  %475 = vperm.xlu0 %3720, %v3047_v5   ;;  %v3052_v11 = vadd.s32 4294967295, %v349_v9  ;;  %v3053_v16 = vadd.s32 4294967295, %v350_v14  ;;  %v353_v17 = vld [vmem:[%s3924_s13 + $0x48] sm:$0xff]  ;;  %v3055_v20 = vadd.s32 4294967295, %v352_v18  ;;  %v355_v21 = vld [vmem:[%s3924_s13 + $0x58] sm:$0xff]  ;;  %v354_v22 = vld [vmem:[%s3924_s13 + $0x50] sm:$0xff] }
  0x1c   : > { %v3056_v19 = vadd.s32 4294967295, %v353_v17  ;;  %v357_v23 = vld [vmem:[%s3924_s13 + $0x68] sm:$0xff]  ;;  %v356_v24 = vld [vmem:[%s3924_s13 + $0x60] sm:$0xff]  ;;  %v359_v25 = vld [vmem:[%s3924_s13 + $0x78] sm:$0xff]  ;;  %v3058_v32 = vadd.s32 4294967295, %v355_v21  ;;  %v3057_v33 = vadd.s32 4294967295, %v354_v22 }
  0x1d   : > { %v358_v26 = vld [vmem:[%s3924_s13 + $0x70] sm:$0xff]  ;;  %v361_v27 = vld [vmem:[%s3924_s13 + $0x88] sm:$0xff]  ;;  %v360_v28 = vld [vmem:[%s3924_s13 + $0x80] sm:$0xff]  ;;  %v3060_v34 = vadd.s32 4294967295, %v357_v23  ;;  %v3059_v37 = vadd.s32 4294967295, %v356_v24  ;;  %v3062_v38 = vadd.s32 4294967295, %v359_v25 }
  0x1e   : > { %v363_v29 = vld [vmem:[%s3924_s13 + $0x98] sm:$0xff]  ;;  %v362_v30 = vld [vmem:[%s3924_s13 + $0x90] sm:$0xff]  ;;  %v365_v31 = vld [vmem:[%s3924_s13 + $0xa8] sm:$0xff]  ;;  %v3061_v39 = vadd.s32 4294967295, %v358_v26  ;;  %v3064_v40 = vadd.s32 4294967295, %v361_v27  ;;  %v3063_v42 = vadd.s32 4294967295, %v360_v28 }
  0x1f   : > { %484 = vperm.xlu1 %3721, %v3050_v7   ;;  %478 = vperm.xlu0 %3720, %v3048_v8   ;;  %v364_v35 = vld [vmem:[%s3924_s13 + $0xa0] sm:$0xff]  ;;  %v367_v36 = vld [vmem:[%s3924_s13 + $0xb8] sm:$0xff]  ;;  %v366_v41 = vld [vmem:[%s3924_s13 + $0xb0] sm:$0xff]  ;;  %v3066_v43 = vadd.s32 4294967295, %v363_v29  ;;  %v3065_v44 = vadd.s32 4294967295, %v362_v30  ;;  %v3068_v45 = vadd.s32 4294967295, %v365_v31 }
  0x20   : > { %v3067_v46 = vadd.s32 4294967295, %v364_v35  ;;  %v3070_v47 = vadd.s32 4294967295, %v367_v36  ;;  %v3069_v50 = vadd.s32 4294967295, %v366_v41  ;;  %v369_v52 = vld [vmem:[%s3924_s13 + $0xc8] sm:$0xff]  ;;  %v368_v53 = vld [vmem:[%s3924_s13 + $0xc0] sm:$0xff]  ;;  %v371_v56 = vld [vmem:[%s3924_s13 + $0xd8] sm:$0xff] }
  0x21   : > { %v3072_v54 = vadd.s32 4294967295, %v369_v52  ;;  %v3071_v55 = vadd.s32 4294967295, %v368_v53  ;;  %v370_v57 = vld [vmem:[%s3924_s13 + $0xd0] sm:$0xff]  ;;  %v3074_v58 = vadd.s32 4294967295, %v371_v56  ;;  %v373_v60 = vld [vmem:[%s3924_s13 + $0xe8] sm:$0xff]  ;;  %v372_v61 = vld [vmem:[%s3924_s13 + $0xe0] sm:$0xff] }
  0x22   : > { %v3073_v59 = vadd.s32 4294967295, %v370_v57  ;;  %v3076_v62 = vadd.s32 4294967295, %v373_v60  ;;  %v3075_v63 = vadd.s32 4294967295, %v372_v61  ;;  %v375_v0 = vld [vmem:[%s3924_s13 + $0xf8] sm:$0xff]  ;;  %v374_v1 = vld [vmem:[%s3924_s13 + $0xf0] sm:$0xff]  ;;  %v377_v4 = vld [vmem:[%s3924_s13 + $0x108] sm:$0xff] }
  0x23   : > { %490 = vperm.xlu1 %3721, %v3052_v11   ;;  %487 = vperm.xlu0 %3720, %v3051_v12   ;;  %v3078_v2 = vadd.s32 4294967295, %v375_v0  ;;  %v3077_v3 = vadd.s32 4294967295, %v374_v1  ;;  %v376_v5 = vld [vmem:[%s3924_s13 + $0x100] sm:$0xff]  ;;  %v3080_v6 = vadd.s32 4294967295, %v377_v4  ;;  %v379_v8 = vld [vmem:[%s3924_s13 + $0x118] sm:$0xff]  ;;  %v378_v9 = vld [vmem:[%s3924_s13 + $0x110] sm:$0xff] }
  0x24   : > { %v3079_v7 = vadd.s32 4294967295, %v376_v5  ;;  %v3082_v10 = vadd.s32 4294967295, %v379_v8  ;;  %v3081_v11 = vadd.s32 4294967295, %v378_v9  ;;  %v381_v12 = vld [vmem:[%s3924_s13 + $0x128] sm:$0xff]  ;;  %v380_v13 = vld [vmem:[%s3924_s13 + $0x120] sm:$0xff]  ;;  %v382_v17 = vld [vmem:[%s3924_s13 + $0x130] sm:$0xff]  ;;  %v472_v5 = vlaneseq }
  0x25   : > { %v3084_v14 = vadd.s32 4294967295, %v381_v12  ;;  %v384_v21 = vld [vmem:[%s3924_s13 + $0x140] sm:$0xff]  ;;  %v387_v24 = vld [vmem:[%s3924_s13 + $0x158] sm:$0xff]  ;;  %v386_v25 = vld [vmem:[%s3924_s13 + $0x150] sm:$0xff]  ;;  %s3769_s10 = sshll.u32 %s3831_s9, 4  ;;  %s3770_s10 = int_to_ptr.vmem [resolvable:$false] %s3769_s10 }
  0x26   : > { %v3087_v23 = vadd.s32 4294967295, %v384_v21  ;;  %v3090_v26 = vadd.s32 4294967295, %v387_v24  ;;  %v3089_v27 = vadd.s32 4294967295, %v386_v25  ;;  %v389_v28 = vld [vmem:[%s3924_s13 + $0x168] sm:$0xff]  ;;  %v388_v29 = vld [vmem:[%s3924_s13 + $0x160] sm:$0xff]  ;;  %v394_v41 = vld [vmem:[%s3924_s13 + $0x190] sm:$0xff] }
  0x27   : > { %496 = vperm.xlu1 %3721, %v3054_v15   ;;  %493 = vperm.xlu0 %3720, %v3053_v16   ;;  %v3083_v15 = vadd.s32 4294967295, %v380_v13  ;;  %v383_v16 = vld [vmem:[%s3924_s13 + $0x138] sm:$0xff]  ;;  %v3092_v30 = vadd.s32 4294967295, %v389_v28  ;;  %v3091_v31 = vadd.s32 4294967295, %v388_v29  ;;  %v393_v36 = vld [vmem:[%s3924_s13 + $0x188] sm:$0xff] }
  0x28   : > { %v3086_v18 = vadd.s32 4294967295, %v383_v16  ;;  %v399_v48 = vld [vmem:[%s3924_s13 + $0x1b8] sm:$0xff]  ;;  %v401_v53 = vld [vmem:[%s3924_s13 + $0x1c8] sm:$0xff] }
  0x29   : > { %v3102_v51 = vadd.s32 4294967295, %v399_v48  ;;  %v403_v57 = vld [vmem:[%s3924_s13 + $0x1d8] sm:$0xff]  ;;  %v405_v61 = vld [vmem:[%s3924_s13 + $0x1e8] sm:$0xff] }
  0x2a   : > { %v407_v1 = vld [vmem:[%s3924_s13 + $0x1f8] sm:$0xff] }
  0x2b   : > { %502 = vperm.xlu1 %3721, %v3056_v19   ;;  %499 = vperm.xlu0 %3720, %v3055_v20   ;;  %v3085_v19 = vadd.s32 4294967295, %v382_v17  ;;  %v385_v20 = vld [vmem:[%s3924_s13 + $0x148] sm:$0xff] }
  0x2c   : > { %v3088_v22 = vadd.s32 4294967295, %v385_v20  ;;  %v3723_v20 = vld [vmem:[%s4640_s3 + $0x8] sm:$0xff]  }
  0x2f   : > { %508 = vperm.xlu1 %3721, %v3058_v32   ;;  %505 = vperm.xlu0 %3720, %v3057_v33   ;;  %v391_v32 = vld [vmem:[%s3924_s13 + $0x178] sm:$0xff]  ;;  %v390_v33 = vld [vmem:[%s3924_s13 + $0x170] sm:$0xff] }
  0x30   : > { %v3093_v35 = vadd.s32 4294967295, %v390_v33 }
  0x33   : > { %514 = vperm.xlu1 %3721, %v3060_v34   ;;  %511 = vperm.xlu0 %3720, %v3059_v37   ;;  %v3094_v34 = vadd.s32 4294967295, %v391_v32  ;;  %v392_v37 = vld [vmem:[%s3924_s13 + $0x180] sm:$0xff] }
  0x37   : > { %520 = vperm.xlu1 %3721, %v3062_v38   ;;  %517 = vperm.xlu0 %3720, %v3061_v39   ;;  %v3096_v38 = vadd.s32 4294967295, %v393_v36  ;;  %v3095_v39 = vadd.s32 4294967295, %v392_v37 }
  0x3b   : > { %526 = vperm.xlu1 %3721, %v3064_v40   ;;  %523 = vperm.xlu0 %3720, %v3063_v42   ;;  %v395_v40 = vld [vmem:[%s3924_s13 + $0x198] sm:$0xff] }
  0x3c   : > { %v3098_v42 = vadd.s32 4294967295, %v395_v40 }
  0x3f   : > { %532 = vperm.xlu1 %3721, %v3066_v43   ;;  %529 = vperm.xlu0 %3720, %v3065_v44   ;;  %v3097_v43 = vadd.s32 4294967295, %v394_v41  ;;  %v397_v44 = vld [vmem:[%s3924_s13 + $0x1a8] sm:$0xff] }
  0x43   : > { %538 = vperm.xlu1 %3721, %v3068_v45   ;;  %535 = vperm.xlu0 %3720, %v3067_v46   ;;  %v396_v45 = vld [vmem:[%s3924_s13 + $0x1a0] sm:$0xff]  ;;  %v3100_v46 = vadd.s32 4294967295, %v397_v44 }
  0x47   : > { %544 = vperm.xlu1 %3721, %v3070_v47   ;;  %541 = vperm.xlu0 %3720, %v3069_v50   ;;  %v3099_v47 = vadd.s32 4294967295, %v396_v45  ;;  %v398_v50 = vld [vmem:[%s3924_s13 + $0x1b0] sm:$0xff] }
  0x48   : > { %v3101_v52 = vadd.s32 4294967295, %v398_v50 }
  0x4b   : > { %550 = vperm.xlu1 %3721, %v3072_v54   ;;  %547 = vperm.xlu0 %3720, %v3071_v55   ;;  %v400_v54 = vld [vmem:[%s3924_s13 + $0x1c0] sm:$0xff]  ;;  %v3104_v55 = vadd.s32 4294967295, %v401_v53 }
  0x4c   : > { %v3103_v56 = vadd.s32 4294967295, %v400_v54 }
  0x4f   : > { %556 = vperm.xlu1 %3721, %v3074_v58   ;;  %553 = vperm.xlu0 %3720, %v3073_v59   ;;  %v402_v58 = vld [vmem:[%s3924_s13 + $0x1d0] sm:$0xff]  ;;  %v3106_v59 = vadd.s32 4294967295, %v403_v57 }
  0x50   : > { %v3105_v60 = vadd.s32 4294967295, %v402_v58 }
  0x53   : > { %562 = vperm.xlu1 %3721, %v3076_v62   ;;  %559 = vperm.xlu0 %3720, %v3075_v63   ;;  %v404_v62 = vld [vmem:[%s3924_s13 + $0x1e0] sm:$0xff]  ;;  %v3108_v63 = vadd.s32 4294967295, %v405_v61 }
  0x54   : > { %v3107_v0 = vadd.s32 4294967295, %v404_v62 }
  0x57   : > { %568 = vperm.xlu1 %3721, %v3078_v2   ;;  %565 = vperm.xlu0 %3720, %v3077_v3   ;;  %v406_v2 = vld [vmem:[%s3924_s13 + $0x1f0] sm:$0xff]  ;;  %v3110_v3 = vadd.s32 4294967295, %v407_v1  ;;  %s3042_s13 = sshll.u32 %s259_s12, 6 }
  0x58   : > { %v3109_v4 = vadd.s32 4294967295, %v406_v2  ;;  %s4385_s14 = scalar_lea.vmem [#allocation2], %s3042_s13 }
  0x59   : > { %s2964_s19 = sshll.u32 %s4385_s14, 4  ;;  %s4589_s19 = int_to_ptr.vmem [resolvable:$true] %s2964_s19 }
  0x5a   : > { %s3765_s29 = scalar_lea.vmem %s4589_s19, 1024  ;;  %p3772_p0 = scmp.lt.s32.totalorder %s4589_s19, %s3770_s10 }
  0x5b   : > { %574 = vperm.xlu1 %3721, %v3080_v6   ;;  %571 = vperm.xlu0 %3720, %v3079_v7   ;;  %v4005_v6 = vand.u32 127, %v472_v5  ;;  %p3766_p11 = scmp.ne.s32.totalorder %s4589_s19, %s3765_s29 }
  0x5d   : > { %p3767_p12 = pnand %p3766_p11, %p3907_p5 }
  0x5f   : > { %580 = vperm.xlu1 %3721, %v3082_v10   ;;  %577 = vperm.xlu0 %3720, %v3081_v11   ;;  %v3830_v11 = vmov 0.0   ;;  %p3768_p13 = pneg %p3767_p12 }
  0x63   : > { %586 = vperm.xlu1 %3721, %v3084_v14   ;;  %583 = vperm.xlu0 %3720, %v3083_v15  }
  0x67   : > { %592 = vperm.xlu1 %3721, %v3086_v18   ;;  %589 = vperm.xlu0 %3720, %v3085_v19  }
  0x6b   : > { %598 = vperm.xlu1 %3721, %v3088_v22   ;;  %595 = vperm.xlu0 %3720, %v3087_v23  }
  0x6f   : > { %604 = vperm.xlu1 %3721, %v3090_v26   ;;  %601 = vperm.xlu0 %3720, %v3089_v27  }
  0x73   : > { %610 = vperm.xlu1 %3721, %v3092_v30   ;;  %607 = vperm.xlu0 %3720, %v3091_v31  }
  0x77   : > { %616 = vperm.xlu1 %3721, %v3094_v34   ;;  %613 = vperm.xlu0 %3720, %v3093_v35  }
  0x7b   : > { %622 = vperm.xlu1 %3721, %v3096_v38   ;;  %619 = vperm.xlu0 %3720, %v3095_v39  }
  0x7f   : > { %628 = vperm.xlu1 %3721, %v3098_v42   ;;  %625 = vperm.xlu0 %3720, %v3097_v43  }
  0x83   : > { %634 = vperm.xlu1 %3721, %v3100_v46   ;;  %631 = vperm.xlu0 %3720, %v3099_v47  }
  0x87   : > { %640 = vperm.xlu1 %3721, %v3102_v51   ;;  %637 = vperm.xlu0 %3720, %v3101_v52  }
  0x8b   : > { %646 = vperm.xlu1 %3721, %v3104_v55   ;;  %643 = vperm.xlu0 %3720, %v3103_v56  }
  0x8f   : > { %652 = vperm.xlu1 %3721, %v3106_v59   ;;  %649 = vperm.xlu0 %3720, %v3105_v60  }
  0x93   : > { %658 = vperm.xlu1 %3721, %v3108_v63   ;;  %655 = vperm.xlu0 %3720, %v3107_v0  }
  0x97   : > { %664 = vperm.xlu1 %3721, %v3110_v3   ;;  %661 = vperm.xlu0 %3720, %v3109_v4  }
  0x9a   : > { %v482_v7 = vpop.permute.xlu1 %481  ;;  %v476_v8 = vpop.permute.xlu0 %475 }
  0x9b   : > { %vm668_vm1 = vcmp.eq.s32.totalorder %v482_v7, %v4005_v6  ;;  %vm666_vm2 = vcmp.eq.s32.totalorder %v476_v8, %v4005_v6 }
  0x9c   : > { %v3113_v12 = vsel %vm668_vm1, 1.0, %v3830_v11  ;;  %v3111_v13 = vsel %vm666_vm2, 1.0, %v3830_v11 }
  0x9e   : > { %v485_v9 = vpop.permute.xlu1 %484  ;;  %v479_v10 = vpop.permute.xlu0 %478 }
  0x9f   : > { %vm669_vm3 = vcmp.eq.s32.totalorder %v485_v9, %v4005_v6  ;;  %vm667_vm4 = vcmp.eq.s32.totalorder %v479_v10, %v4005_v6 }
  0xa0   : > { %v3114_v14 = vsel %vm669_vm3, 1.0, %v3830_v11  ;;  %v3112_v15 = vsel %vm667_vm4, 1.0, %v3830_v11 }
  0xa1   : > { %v859_v16 = vpack.c.bf16 %v3114_v14, %v3113_v12  ;;  %v858_v17 = vpack.c.bf16 %v3112_v15, %v3111_v13 }
  0xa2   : > { %v491_v18 = vpop.permute.xlu1 %490  ;;  %v488_v19 = vpop.permute.xlu0 %487 }
  0xa3   : > { %vm671_vm6 = vcmp.eq.s32.totalorder %v491_v18, %v4005_v6  ;;  %vm670_vm7 = vcmp.eq.s32.totalorder %v488_v19, %v4005_v6  ;;  %3397 = vmatprep.mubr.msk.bf16.mxu0 %vm891_vm5, %v858_v17 }
  0xa4   : > { %v3116_v21 = vsel %vm671_vm6, 1.0, %v3830_v11  ;;  %v3115_v22 = vsel %vm670_vm7, 1.0, %v3830_v11  ;;  %3398 = vmatmul.mubr.msk.bf16.vlgmr.msra.gmra.mrb[0].mxu0 %vm891_vm5, %v859_v16 }
  0xa5   : > { %v860_v23 = vpack.c.bf16 %v3116_v21, %v3115_v22  ;;  %3462 = vmatpush3.bf16.msra.mxu0 %v3962_v49 }
  0xa6   : > { %v497_v24 = vpop.permute.xlu1 %496  ;;  %v494_v25 = vpop.permute.xlu0 %493  ;;  %3463 = vmatprep.subr.bf16.mxu0 %v3723_v20 }
  0xa7   : > { %vm673_vm8 = vcmp.eq.s32.totalorder %v497_v24, %v4005_v6  ;;  %vm672_vm9 = vcmp.eq.s32.totalorder %v494_v25, %v4005_v6  ;;  %3401 = vmatprep.mubr.msk.bf16.mxu0 %vm891_vm5, %v860_v23 }
  0xa8   : > { %v3118_v26 = vsel %vm673_vm8, 1.0, %v3830_v11  ;;  %v3117_v27 = vsel %vm672_vm9, 1.0, %v3830_v11 }
  0xa9   : > { %v861_v28 = vpack.c.bf16 %v3118_v26, %v3117_v27  ;;  %3464 = vmatpush3.bf16.msra.mxu0 %v3723_v20  ;;  %v3724_v27 = vld [vmem:[%s3954_s17] sm:$0xff]  }
  0xaa   : > { %v503_v29 = vpop.permute.xlu1 %502  ;;  %v500_v30 = vpop.permute.xlu0 %499 }
  0xab   : > { %vm675_vm10 = vcmp.eq.s32.totalorder %v503_v29, %v4005_v6  ;;  %vm674_vm11 = vcmp.eq.s32.totalorder %v500_v30, %v4005_v6 }
  0xac   : > { %v3120_v49 = vsel %vm675_vm10, 1.0, %v3830_v11  ;;  %v3119_v31 = vsel %vm674_vm11, 1.0, %v3830_v11  ;;  %3402 = vmatmul.mubr.msk.bf16.gmra.mrb[4].mxu0 %vm891_vm5, %v861_v28 }
  0xad   : > { %v862_v32 = vpack.c.bf16 %v3120_v49, %v3119_v31  ;;  %v3756_v31 = vld [vmem:[%s4641_s4] sm:$0xff]  }
  0xae   : > { %v509_v33 = vpop.permute.xlu1 %508  ;;  %v506_v34 = vpop.permute.xlu0 %505  ;;  %3529 = vmatprep.subr.bf16.mxu1 %v3756_v31 }
  0xaf   : > { %vm677_vm12 = vcmp.eq.s32.totalorder %v509_v33, %v4005_v6  ;;  %vm676_vm13 = vcmp.eq.s32.totalorder %v506_v34, %v4005_v6  ;;  %3405 = vmatprep.mubr.msk.bf16.mxu0 %vm891_vm5, %v862_v32 }
  0xb0   : > { %v3122_v35 = vsel %vm677_vm12, 1.0, %v3830_v11  ;;  %v3121_v36 = vsel %vm676_vm13, 1.0, %v3830_v11 }
  0xb1   : > { %v863_v37 = vpack.c.bf16 %v3122_v35, %v3121_v36 }
  0xb2   : > { %v515_v38 = vpop.permute.xlu1 %514  ;;  %v512_v39 = vpop.permute.xlu0 %511 }
  0xb3   : > { %vm679_vm14 = vcmp.eq.s32.totalorder %v515_v38, %v4005_v6  ;;  %vm678_vm15 = vcmp.eq.s32.totalorder %v512_v39, %v4005_v6  ;;  %v3726_v39 = vld [vmem:[%s3954_s17 + $0x10] sm:$0xff]  }
  0xb4   : > { %v3124_v40 = vsel %vm679_vm14, 1.0, %v3830_v11  ;;  %v3123_v41 = vsel %vm678_vm15, 1.0, %v3830_v11  ;;  %3406 = vmatmul.mubr.msk.bf16.gmra.mrb[8].mxu0 %vm891_vm5, %v863_v37  ;;  %v3725_v37 = vld [vmem:[%s3954_s17 + $0x8] sm:$0xff]  }
  0xb5   : > { %v864_v42 = vpack.c.bf16 %v3124_v40, %v3123_v41  ;;  %v3757_v40 = vld [vmem:[%s4641_s4 + $0x8] sm:$0xff]  }
  0xb6   : > { %v521_v43 = vpop.permute.xlu1 %520  ;;  %v518_v44 = vpop.permute.xlu0 %517 }
  0xb7   : > { %vm681_vm0 = vcmp.eq.s32.totalorder %v521_v43, %v4005_v6  ;;  %vm680_vm1 = vcmp.eq.s32.totalorder %v518_v44, %v4005_v6  ;;  %3409 = vmatprep.mubr.msk.bf16.mxu0 %vm891_vm5, %v864_v42 }
  0xb8   : > { %v3126_v45 = vsel %vm681_vm0, 1.0, %v3830_v11  ;;  %v3125_v46 = vsel %vm680_vm1, 1.0, %v3830_v11 }
  0xb9   : > { %v865_v47 = vpack.c.bf16 %v3126_v45, %v3125_v46  ;;  %v3758_v46 = vld [vmem:[%s4641_s4 + $0x10] sm:$0xff]  }
  0xba   : > { %v527_v48 = vpop.permute.xlu1 %526  ;;  %v524_v50 = vpop.permute.xlu0 %523 }
  0xbb   : > { %vm683_vm2 = vcmp.eq.s32.totalorder %v527_v48, %v4005_v6  ;;  %vm682_vm3 = vcmp.eq.s32.totalorder %v524_v50, %v4005_v6 }
  0xbc   : > { %v3128_v51 = vsel %vm683_vm2, 1.0, %v3830_v11  ;;  %v3127_v52 = vsel %vm682_vm3, 1.0, %v3830_v11  ;;  %3410 = vmatmul.mubr.msk.bf16.gmra.mrb[12].mxu0 %vm891_vm5, %v865_v47  ;;  %vm1453_vm3 = vcmask 261120  }
  0xbd   : > { %v866_v53 = vpack.c.bf16 %v3128_v51, %v3127_v52  ;;  %v3727_v52 = vld [vmem:[%s3954_s17 + $0x18] sm:$0xff]  }
  0xbe   : > { %v533_v54 = vpop.permute.xlu1 %532  ;;  %v530_v55 = vpop.permute.xlu0 %529 }
  0xbf   : > { %vm685_vm4 = vcmp.eq.s32.totalorder %v533_v54, %v4005_v6  ;;  %vm684_vm6 = vcmp.eq.s32.totalorder %v530_v55, %v4005_v6  ;;  %3413 = vmatprep.mubr.msk.bf16.mxu0 %vm891_vm5, %v866_v53  ;;  %v3728_v54 = vld [vmem:[%s3954_s17 + $0x20] sm:$0xff]   ;;  %v3759_v55 = vld [vmem:[%s4641_s4 + $0x18] sm:$0xff]  }
  0xc0   : > { %v3130_v56 = vsel %vm685_vm4, 1.0, %v3830_v11  ;;  %v3129_v57 = vsel %vm684_vm6, 1.0, %v3830_v11 }
  0xc1   : > { %v867_v58 = vpack.c.bf16 %v3130_v56, %v3129_v57 }
  0xc2   : > { %v539_v59 = vpop.permute.xlu1 %538  ;;  %v536_v60 = vpop.permute.xlu0 %535 }
  0xc3   : > { %vm687_vm7 = vcmp.eq.s32.totalorder %v539_v59, %v4005_v6  ;;  %vm686_vm8 = vcmp.eq.s32.totalorder %v536_v60, %v4005_v6 }
  0xc4   : > { %v3132_v61 = vsel %vm687_vm7, 1.0, %v3830_v11  ;;  %v3131_v62 = vsel %vm686_vm8, 1.0, %v3830_v11  ;;  %3414 = vmatmul.mubr.msk.bf16.gmra.mrb[16].mxu0 %vm891_vm5, %v867_v58 }
  0xc5   : > { %v868_v63 = vpack.c.bf16 %v3132_v61, %v3131_v62  ;;  %v3760_v61 = vld [vmem:[%s4641_s4 + $0x20] sm:$0xff]  }
  0xc6   : > { %v545_v0 = vpop.permute.xlu1 %544  ;;  %v542_v1 = vpop.permute.xlu0 %541 }
  0xc7   : > { %vm689_vm9 = vcmp.eq.s32.totalorder %v545_v0, %v4005_v6  ;;  %vm688_vm10 = vcmp.eq.s32.totalorder %v542_v1, %v4005_v6  ;;  %3417 = vmatprep.mubr.msk.bf16.mxu0 %vm891_vm5, %v868_v63 }
  0xc8   : > { %v3134_v2 = vsel %vm689_vm9, 1.0, %v3830_v11  ;;  %v3133_v3 = vsel %vm688_vm10, 1.0, %v3830_v11 }
  0xc9   : > { %v869_v4 = vpack.c.bf16 %v3134_v2, %v3133_v3  ;;  %v3729_v2 = vld [vmem:[%s3954_s17 + $0x28] sm:$0xff]  }
  0xca   : > { %v551_v5 = vpop.permute.xlu1 %550  ;;  %v548_v7 = vpop.permute.xlu0 %547 }
  0xcb   : > { %vm691_vm11 = vcmp.eq.s32.totalorder %v551_v5, %v4005_v6  ;;  %vm690_vm12 = vcmp.eq.s32.totalorder %v548_v7, %v4005_v6  ;;  %v3761_v5 = vld [vmem:[%s4641_s4 + $0x28] sm:$0xff]  }
  0xcc   : > { %v3136_v8 = vsel %vm691_vm11, 1.0, %v3830_v11  ;;  %v3135_v9 = vsel %vm690_vm12, 1.0, %v3830_v11  ;;  %3418 = vmatmul.mubr.msk.bf16.gmra.mrb[20].mxu0 %vm891_vm5, %v869_v4  ;;  %v3730_v4 = vld [vmem:[%s3954_s17 + $0x30] sm:$0xff]  }
  0xcd   : > { %v870_v10 = vpack.c.bf16 %v3136_v8, %v3135_v9 }
  0xce   : > { %v557_v12 = vpop.permute.xlu1 %556  ;;  %v554_v13 = vpop.permute.xlu0 %553 }
  0xcf   : > { %vm693_vm13 = vcmp.eq.s32.totalorder %v557_v12, %v4005_v6  ;;  %vm692_vm14 = vcmp.eq.s32.totalorder %v554_v13, %v4005_v6  ;;  %3421 = vmatprep.mubr.msk.bf16.mxu0 %vm891_vm5, %v870_v10  ;;  %v3762_v13 = vld [vmem:[%s4641_s4 + $0x30] sm:$0xff]  }
  0xd0   : > { %v3138_v14 = vsel %vm693_vm13, 1.0, %v3830_v11  ;;  %v3137_v15 = vsel %vm692_vm14, 1.0, %v3830_v11 }
  0xd1   : > { %v871_v16 = vpack.c.bf16 %v3138_v14, %v3137_v15 }
  0xd2   : > { %v563_v17 = vpop.permute.xlu1 %562  ;;  %v560_v18 = vpop.permute.xlu0 %559 }
  0xd3   : > { %vm695_vm15 = vcmp.eq.s32.totalorder %v563_v17, %v4005_v6  ;;  %vm694_vm0 = vcmp.eq.s32.totalorder %v560_v18, %v4005_v6  ;;  %v3731_v18 = vld [vmem:[%s3954_s17 + $0x38] sm:$0xff]  }
  0xd4   : > { %v3140_v19 = vsel %vm695_vm15, 1.0, %v3830_v11  ;;  %v3139_v20 = vsel %vm694_vm0, 1.0, %v3830_v11  ;;  %3422 = vmatmul.mubr.msk.bf16.gmra.mrb[24].mxu0 %vm891_vm5, %v871_v16 }
  0xd5   : > { %v872_v21 = vpack.c.bf16 %v3140_v19, %v3139_v20  ;;  %v3732_v20 = vld [vmem:[%s3954_s17 + $0x40] sm:$0xff]  }
  0xd6   : > { %v569_v22 = vpop.permute.xlu1 %568  ;;  %v566_v23 = vpop.permute.xlu0 %565 }
  0xd7   : > { %vm697_vm1 = vcmp.eq.s32.totalorder %v569_v22, %v4005_v6  ;;  %vm696_vm2 = vcmp.eq.s32.totalorder %v566_v23, %v4005_v6  ;;  %3425 = vmatprep.mubr.msk.bf16.mxu0 %vm891_vm5, %v872_v21 }
  0xd8   : > { %v3142_v24 = vsel %vm697_vm1, 1.0, %v3830_v11  ;;  %v3141_v25 = vsel %vm696_vm2, 1.0, %v3830_v11 }
  0xd9   : > { %v873_v26 = vpack.c.bf16 %v3142_v24, %v3141_v25 }
  0xda   : > { %v575_v28 = vpop.permute.xlu1 %574  ;;  %v572_v29 = vpop.permute.xlu0 %571 }
  0xdb   : > { %vm699_vm4 = vcmp.eq.s32.totalorder %v575_v28, %v4005_v6  ;;  %vm698_vm6 = vcmp.eq.s32.totalorder %v572_v29, %v4005_v6 }
  0xdc   : > { %v3144_v30 = vsel %vm699_vm4, 1.0, %v3830_v11  ;;  %v3143_v49 = vsel %vm698_vm6, 1.0, %v3830_v11  ;;  %3426 = vmatmul.mubr.msk.bf16.gmra.mrb[28].mxu0 %vm891_vm5, %v873_v26 }
  0xdd   : > { %v874_v32 = vpack.c.bf16 %v3144_v30, %v3143_v49  ;;  %3465 = vmatprep.mubr.msk.bf16.mxu0 %vm1453_vm3, %v3724_v27  ;;  %v3733_v30 = vld [vmem:[%s3954_s17 + $0x48] sm:$0xff]  }
  0xde   : > { %v581_v33 = vpop.permute.xlu1 %580  ;;  %v578_v34 = vpop.permute.xlu0 %577 }
  0xdf   : > { %vm701_vm7 = vcmp.eq.s32.totalorder %v581_v33, %v4005_v6  ;;  %vm700_vm8 = vcmp.eq.s32.totalorder %v578_v34, %v4005_v6  ;;  %3429 = vmatprep.mubr.msk.bf16.mxu1 %vm891_vm5, %v874_v32 }
  0xe0   : > { %v3146_v35 = vsel %vm701_vm7, 1.0, %v3830_v11  ;;  %v3145_v36 = vsel %vm700_vm8, 1.0, %v3830_v11 }
  0xe1   : > { %v875_v38 = vpack.c.bf16 %v3146_v35, %v3145_v36 }
  0xe2   : > { %v587_v41 = vpop.permute.xlu1 %586  ;;  %v584_v42 = vpop.permute.xlu0 %583 }
  0xe3   : > { %vm703_vm9 = vcmp.eq.s32.totalorder %v587_v41, %v4005_v6  ;;  %vm702_vm10 = vcmp.eq.s32.totalorder %v584_v42, %v4005_v6  ;;  %3430 = vmatmul.mubr.msk.bf16.vlgmr.msra.gmra.mrb[0].mxu1 %vm891_vm5, %v875_v38  ;;  %v3735_v41 = vld [vmem:[%s3954_s17 + $0x58] sm:$0xff]  }
  0xe4   : > { %v3148_v43 = vsel %vm703_vm9, 1.0, %v3830_v11  ;;  %v3147_v44 = vsel %vm702_vm10, 1.0, %v3830_v11  ;;  %3466 = vmatmul.mubr.msk.bf16.vlgmr.msra.gmra.mrb[0].mxu0 %vm1453_vm3, %v3725_v37  ;;  %3530 = vmatpush3.bf16.msra.mxu1 %v3756_v31  ;;  %v3734_v31 = vld [vmem:[%s3954_s17 + $0x50] sm:$0xff]  }
  0xe5   : > { %v876_v45 = vpack.c.bf16 %v3148_v43, %v3147_v44  ;;  %3469 = vmatprep.mubr.msk.bf16.mxu0 %vm1453_vm3, %v3726_v39  ;;  %3531 = vmatprep.subr.bf16.mxu1 %v3757_v40  ;;  %v3736_v43 = vld [vmem:[%s3954_s17 + $0x60] sm:$0xff]  }
  0xe6   : > { %v593_v47 = vpop.permute.xlu1 %592  ;;  %v590_v48 = vpop.permute.xlu0 %589 }
  0xe7   : > { %vm705_vm11 = vcmp.eq.s32.totalorder %v593_v47, %v4005_v6  ;;  %vm704_vm12 = vcmp.eq.s32.totalorder %v590_v48, %v4005_v6  ;;  %3433 = vmatprep.mubr.msk.bf16.mxu1 %vm891_vm5, %v876_v45 }
  0xe8   : > { %v3150_v50 = vsel %vm705_vm11, 1.0, %v3830_v11  ;;  %v3149_v51 = vsel %vm704_vm12, 1.0, %v3830_v11  ;;  %3532 = vmatpush3.bf16.msra.mxu1 %v3757_v40 }
  0xe9   : > { %v877_v53 = vpack.c.bf16 %v3150_v50, %v3149_v51  ;;  %3533 = vmatprep.subr.bf16.mxu1 %v3758_v46 }
  0xea   : > { %v599_v56 = vpop.permute.xlu1 %598  ;;  %v596_v57 = vpop.permute.xlu0 %595 }
  0xeb   : > { %vm707_vm13 = vcmp.eq.s32.totalorder %v599_v56, %v4005_v6  ;;  %vm706_vm14 = vcmp.eq.s32.totalorder %v596_v57, %v4005_v6  ;;  %3434 = vmatmul.mubr.msk.bf16.gmra.mrb[4].mxu1 %vm891_vm5, %v877_v53  ;;  %v3738_v56 = vld [vmem:[%s3954_s17 + $0x70] sm:$0xff]  }
  0xec   : > { %v3152_v58 = vsel %vm707_vm13, 1.0, %v3830_v11  ;;  %v3151_v59 = vsel %vm706_vm14, 1.0, %v3830_v11  ;;  %3470 = vmatmul.mubr.msk.bf16.gmra.mrb[4].mxu0 %vm1453_vm3, %v3727_v52  ;;  %3534 = vmatpush3.bf16.msra.mxu1 %v3758_v46 }
  0xed   : > { %v878_v60 = vpack.c.bf16 %v3152_v58, %v3151_v59  ;;  %3473 = vmatprep.mubr.msk.bf16.mxu0 %vm1453_vm3, %v3728_v54  ;;  %3535 = vmatprep.subr.bf16.mxu1 %v3759_v55  ;;  %v3737_v54 = vld [vmem:[%s3954_s17 + $0x68] sm:$0xff]  }
  0xee   : > { %v605_v62 = vpop.permute.xlu1 %604  ;;  %v602_v63 = vpop.permute.xlu0 %601 }
  0xef   : > { %vm709_vm15 = vcmp.eq.s32.totalorder %v605_v62, %v4005_v6  ;;  %vm708_vm0 = vcmp.eq.s32.totalorder %v602_v63, %v4005_v6  ;;  %3437 = vmatprep.mubr.msk.bf16.mxu1 %vm891_vm5, %v878_v60 }
  0xf0   : > { %v3154_v0 = vsel %vm709_vm15, 1.0, %v3830_v11  ;;  %v3153_v1 = vsel %vm708_vm0, 1.0, %v3830_v11  ;;  %3536 = vmatpush3.bf16.msra.mxu1 %v3759_v55 }
  0xf1   : > { %v879_v3 = vpack.c.bf16 %v3154_v0, %v3153_v1  ;;  %3537 = vmatprep.subr.bf16.mxu1 %v3760_v61 }
  0xf2   : > { %v611_v7 = vpop.permute.xlu1 %610  ;;  %v608_v8 = vpop.permute.xlu0 %607 }
  0xf3   : > { %vm711_vm1 = vcmp.eq.s32.totalorder %v611_v7, %v4005_v6  ;;  %vm710_vm2 = vcmp.eq.s32.totalorder %v608_v8, %v4005_v6  ;;  %3438 = vmatmul.mubr.msk.bf16.gmra.mrb[8].mxu1 %vm891_vm5, %v879_v3  ;;  %v3744_v7 = vld [vmem:[%s3954_s17 + $0xa0] sm:$0xff]   ;;  %v3745_v8 = vld [vmem:[%s3954_s17 + $0xa8] sm:$0xff]  }
  0xf4   : > { %v3156_v9 = vsel %vm711_vm1, 1.0, %v3830_v11  ;;  %v3155_v10 = vsel %vm710_vm2, 1.0, %v3830_v11  ;;  %3474 = vmatmul.mubr.msk.bf16.gmra.mrb[8].mxu0 %vm1453_vm3, %v3729_v2  ;;  %3538 = vmatpush3.bf16.msra.mxu1 %v3760_v61  ;;  %v3739_v2 = vld [vmem:[%s3954_s17 + $0x78] sm:$0xff]  }
  0xf5   : > { %v880_v12 = vpack.c.bf16 %v3156_v9, %v3155_v10  ;;  %3477 = vmatprep.mubr.msk.bf16.mxu0 %vm1453_vm3, %v3730_v4  ;;  %3539 = vmatprep.subr.bf16.mxu1 %v3761_v5  ;;  %v3740_v4 = vld [vmem:[%s3954_s17 + $0x80] sm:$0xff]   ;;  %v3746_v9 = vld [vmem:[%s3954_s17 + $0xb0] sm:$0xff]   ;;  %v3747_v10 = vld [vmem:[%s3954_s17 + $0xb8] sm:$0xff]  }
  0xf6   : > { %v617_v14 = vpop.permute.xlu1 %616  ;;  %v614_v15 = vpop.permute.xlu0 %613 }
  0xf7   : > { %vm713_vm4 = vcmp.eq.s32.totalorder %v617_v14, %v4005_v6  ;;  %vm712_vm6 = vcmp.eq.s32.totalorder %v614_v15, %v4005_v6  ;;  %3441 = vmatprep.mubr.msk.bf16.mxu1 %vm891_vm5, %v880_v12  ;;  %v3748_v12 = vld [vmem:[%s3954_s17 + $0xc0] sm:$0xff]   ;;  %v3749_v14 = vld [vmem:[%s3954_s17 + $0xc8] sm:$0xff]   ;;  %v3750_v15 = vld [vmem:[%s3954_s17 + $0xd0] sm:$0xff]  }
  0xf8   : > { %v3158_v16 = vsel %vm713_vm4, 1.0, %v3830_v11  ;;  %v3157_v17 = vsel %vm712_vm6, 1.0, %v3830_v11  ;;  %3540 = vmatpush3.bf16.msra.mxu1 %v3761_v5  ;;  %v3742_v5 = vld [vmem:[%s3954_s17 + $0x90] sm:$0xff]  }
  0xf9   : > { %v881_v19 = vpack.c.bf16 %v3158_v16, %v3157_v17  ;;  %3541 = vmatprep.subr.bf16.mxu1 %v3762_v13  ;;  %v3751_v16 = vld [vmem:[%s3954_s17 + $0xd8] sm:$0xff]   ;;  %v3752_v17 = vld [vmem:[%s3954_s17 + $0xe0] sm:$0xff]  }
  0xfa   : > { %v623_v21 = vpop.permute.xlu1 %622  ;;  %v620_v22 = vpop.permute.xlu0 %619 }
  0xfb   : > { %vm715_vm7 = vcmp.eq.s32.totalorder %v623_v21, %v4005_v6  ;;  %vm714_vm8 = vcmp.eq.s32.totalorder %v620_v22, %v4005_v6  ;;  %3442 = vmatmul.mubr.msk.bf16.gmra.mrb[12].mxu1 %vm891_vm5, %v881_v19  ;;  %v3754_v19 = vld [vmem:[%s3954_s17 + $0xf0] sm:$0xff]  }
  0xfc   : > { %v3160_v23 = vsel %vm715_vm7, 1.0, %v3830_v11  ;;  %v3159_v24 = vsel %vm714_vm8, 1.0, %v3830_v11  ;;  %3478 = vmatmul.mubr.msk.bf16.gmra.mrb[12].mxu0 %vm1453_vm3, %v3731_v18  ;;  %3542 = vmatpush3.bf16.msra.mxu1 %v3762_v13  ;;  %v3763_v13 = vld [vmem:[%s4641_s4 + $0x38] sm:$0xff]   ;;  %v3753_v18 = vld [vmem:[%s3954_s17 + $0xe8] sm:$0xff]  }
  0xfd   : > { %v882_v25 = vpack.c.bf16 %v3160_v23, %v3159_v24  ;;  %3481 = vmatprep.mubr.msk.bf16.mxu0 %vm1453_vm3, %v3732_v20  ;;  %3543 = vmatprep.subr.bf16.mxu1 %v3763_v13  ;;  %v3755_v20 = vld [vmem:[%s3954_s17 + $0xf8] sm:$0xff]  }
  0xfe   : > { %v629_v26 = vpop.permute.xlu1 %628  ;;  %v626_v27 = vpop.permute.xlu0 %625 }
  0xff   : > { %vm717_vm9 = vcmp.eq.s32.totalorder %v629_v26, %v4005_v6  ;;  %vm716_vm10 = vcmp.eq.s32.totalorder %v626_v27, %v4005_v6  ;;  %3445 = vmatprep.mubr.msk.bf16.mxu1 %vm891_vm5, %v882_v25 }
 0x100   : > { %v3162_v28 = vsel %vm717_vm9, 1.0, %v3830_v11  ;;  %v3161_v29 = vsel %vm716_vm10, 1.0, %v3830_v11  ;;  %3544 = vmatpush3.bf16.msra.mxu1 %v3763_v13  ;;  %vm2875_vm9 = vcmask 1043459   ;;  %vm2877_vm10 = vcmask 1044484  }
 0x101   : > { %v883_v49 = vpack.c.bf16 %v3162_v28, %v3161_v29 }
 0x102   : > { %v635_v32 = vpop.permute.xlu1 %634  ;;  %v632_v33 = vpop.permute.xlu0 %631 }
 0x103   : > { %vm719_vm11 = vcmp.eq.s32.totalorder %v635_v32, %v4005_v6  ;;  %vm718_vm12 = vcmp.eq.s32.totalorder %v632_v33, %v4005_v6  ;;  %3446 = vmatmul.mubr.msk.bf16.gmra.mrb[16].mxu1 %vm891_vm5, %v883_v49 }
 0x104   : > { %v3164_v34 = vsel %vm719_vm11, 1.0, %v3830_v11  ;;  %v3163_v35 = vsel %vm718_vm12, 1.0, %v3830_v11  ;;  %3482 = vmatmul.mubr.msk.bf16.gmra.mrb[16].mxu0 %vm1453_vm3, %v3733_v30  ;;  %vm2879_vm11 = vcmask 1045509   ;;  %vm2881_vm12 = vcmask 1046534  }
 0x105   : > { %v884_v36 = vpack.c.bf16 %v3164_v34, %v3163_v35  ;;  %3485 = vmatprep.mubr.msk.bf16.mxu0 %vm1453_vm3, %v3734_v31 }
 0x106   : > { %v641_v37 = vpop.permute.xlu1 %640  ;;  %v638_v38 = vpop.permute.xlu0 %637 }
 0x107   : > { %vm721_vm13 = vcmp.eq.s32.totalorder %v641_v37, %v4005_v6  ;;  %vm720_vm14 = vcmp.eq.s32.totalorder %v638_v38, %v4005_v6  ;;  %3449 = vmatprep.mubr.msk.bf16.mxu1 %vm891_vm5, %v884_v36 }
 0x108   : > { %v3166_v39 = vsel %vm721_vm13, 1.0, %v3830_v11  ;;  %v3165_v40 = vsel %vm720_vm14, 1.0, %v3830_v11  ;;  %vm2883_vm13 = vcmask 1047559  }
 0x109   : > { %v885_v42 = vpack.c.bf16 %v3166_v39, %v3165_v40 }
 0x10a   : > { %v647_v44 = vpop.permute.xlu1 %646  ;;  %v644_v45 = vpop.permute.xlu0 %643 }
 0x10b   : > { %vm723_vm15 = vcmp.eq.s32.totalorder %v647_v44, %v4005_v6  ;;  %vm722_vm0 = vcmp.eq.s32.totalorder %v644_v45, %v4005_v6  ;;  %3450 = vmatmul.mubr.msk.bf16.gmra.mrb[20].mxu1 %vm891_vm5, %v885_v42 }
 0x10c   : > { %v3168_v46 = vsel %vm723_vm15, 1.0, %v3830_v11  ;;  %v3167_v47 = vsel %vm722_vm0, 1.0, %v3830_v11  ;;  %3486 = vmatmul.mubr.msk.bf16.gmra.mrb[20].mxu0 %vm1453_vm3, %v3735_v41 }
 0x10d   : > { %v886_v48 = vpack.c.bf16 %v3168_v46, %v3167_v47  ;;  %3489 = vmatprep.mubr.msk.bf16.mxu0 %vm1453_vm3, %v3736_v43 }
 0x10e   : > { %v653_v50 = vpop.permute.xlu1 %652  ;;  %v650_v51 = vpop.permute.xlu0 %649 }
 0x10f   : > { %vm725_vm1 = vcmp.eq.s32.totalorder %v653_v50, %v4005_v6  ;;  %vm724_vm2 = vcmp.eq.s32.totalorder %v650_v51, %v4005_v6  ;;  %3453 = vmatprep.mubr.msk.bf16.mxu1 %vm891_vm5, %v886_v48 }
 0x110   : > { %v3170_v52 = vsel %vm725_vm1, 1.0, %v3830_v11  ;;  %v3169_v53 = vsel %vm724_vm2, 1.0, %v3830_v11 }
 0x111   : > { %v887_v55 = vpack.c.bf16 %v3170_v52, %v3169_v53 }
 0x112   : > { %v659_v57 = vpop.permute.xlu1 %658  ;;  %v656_v58 = vpop.permute.xlu0 %655 }
 0x113   : > { %vm727_vm4 = vcmp.eq.s32.totalorder %v659_v57, %v4005_v6  ;;  %vm726_vm6 = vcmp.eq.s32.totalorder %v656_v58, %v4005_v6  ;;  %3454 = vmatmul.mubr.msk.bf16.gmra.mrb[24].mxu1 %vm891_vm5, %v887_v55 }
 0x114   : > { %v3172_v59 = vsel %vm727_vm4, 1.0, %v3830_v11  ;;  %v3171_v60 = vsel %vm726_vm6, 1.0, %v3830_v11  ;;  %3490 = vmatmul.mubr.msk.bf16.gmra.mrb[24].mxu0 %vm1453_vm3, %v3737_v54 }
 0x115   : > { %v888_v61 = vpack.c.bf16 %v3172_v59, %v3171_v60  ;;  %3493 = vmatprep.mubr.msk.bf16.mxu0 %vm1453_vm3, %v3738_v56 }
 0x116   : > { %v665_v62 = vpop.permute.xlu1 %664  ;;  %v662_v63 = vpop.permute.xlu0 %661 }
 0x117   : > { %vm729_vm7 = vcmp.eq.s32.totalorder %v665_v62, %v4005_v6  ;;  %vm728_vm8 = vcmp.eq.s32.totalorder %v662_v63, %v4005_v6  ;;  %3457 = vmatprep.mubr.msk.bf16.mxu1 %vm891_vm5, %v888_v61  ;;  %v3741_v6 = vld [vmem:[%s3954_s17 + $0x88] sm:$0xff]  }
 0x118   : > { %v3174_v0 = vsel %vm729_vm7, 1.0, %v3830_v11  ;;  %v3173_v1 = vsel %vm728_vm8, 1.0, %v3830_v11  ;;  %v3743_v11 = vld [vmem:[%s3954_s17 + $0x98] sm:$0xff]   ;;  %s3771_s17 = scalar_lea.vmem %s3770_s10, 2048 }
 0x119   : > { %v889_v3 = vpack.c.bf16 %v3174_v0, %v3173_v1  ;;  %p3773_p1 = scmp.lt.s32.totalorder %s3771_s17, %s3765_s29 }
 0x11b   : > { %3458 = vmatmul.mubr.msk.bf16.gmra.mrb[28].mxu1 %vm891_vm5, %v889_v3  ;;  %vm2871_vm5 = vcmask 1041409   ;;  %p3774_p2 = por %p3773_p1, %p3772_p0 }
 0x11c   : > { %3494 = vmatmul.mubr.msk.bf16.gmra.mrb[28].mxu0 %vm1453_vm3, %v3739_v2 }
 0x11d   : > { %3497 = vmatprep.mubr.msk.bf16.mxu0 %vm1453_vm3, %v3740_v4  ;;  %p3775_p3 = pnand %p3774_p2, %p3768_p13 }
 0x124   : > { %3498 = vmatmul.mubr.msk.bf16.gmra.mrb[32].mxu0 %vm1453_vm3, %v3741_v6 }
 0x125   : > { %3501 = vmatprep.mubr.msk.bf16.mxu0 %vm1453_vm3, %v3742_v5 }
 0x12c   : > { %3502 = vmatmul.mubr.msk.bf16.gmra.mrb[36].mxu0 %vm1453_vm3, %v3743_v11 }
 0x12d   : > { %3505 = vmatprep.mubr.msk.bf16.mxu0 %vm1453_vm3, %v3744_v7 }
 0x134   : > { %3506 = vmatmul.mubr.msk.bf16.gmra.mrb[40].mxu0 %vm1453_vm3, %v3745_v8 }
 0x135   : > { %3509 = vmatprep.mubr.msk.bf16.mxu0 %vm1453_vm3, %v3746_v9 }
 0x13c   : > { %3510 = vmatmul.mubr.msk.bf16.gmra.mrb[44].mxu0 %vm1453_vm3, %v3747_v10 }
 0x13d   : > { %3513 = vmatprep.mubr.msk.bf16.mxu0 %vm1453_vm3, %v3748_v12 }
 0x144   : > { %3514 = vmatmul.mubr.msk.bf16.gmra.mrb[48].mxu0 %vm1453_vm3, %v3749_v14 }
 0x145   : > { %3517 = vmatprep.mubr.msk.bf16.mxu0 %vm1453_vm3, %v3750_v15 }
 0x14c   : > { %3518 = vmatmul.mubr.msk.bf16.gmra.mrb[52].mxu0 %vm1453_vm3, %v3751_v16 }
 0x14d   : > { %3521 = vmatprep.mubr.msk.bf16.mxu0 %vm1453_vm3, %v3752_v17 }
 0x154   : > { %3522 = vmatmul.mubr.msk.bf16.gmra.mrb[56].mxu0 %vm1453_vm3, %v3753_v18 }
 0x155   : > { %3525 = vmatprep.mubr.msk.bf16.mxu0 %vm1453_vm3, %v3754_v19 }
 0x15c   : > { %3526 = vmatmul.mubr.msk.bf16.gmra.mrb[60].mxu0 %vm1453_vm3, %v3755_v20  ;;  %vm2873_vm3 = vcmask 1042434  }
 0x1b6   : > { %v4259_v21 = vpop.f32.mrb[0].mxu1 }
 0x1b7   : > { %v4261_v22 = vpop.f32.mrb[1].mxu1  ;;  %v3467_v23 = vpop.f32.mrb[0].mxu0 }
 0x1b8   : > { %v4263_v24 = vpop.f32.mrb[2].mxu1  ;;  %v1584_v25 = vpop.f32.mrb[1].mxu0  ;;  %v1841_v28 = vmax.f32 %v3467_v23, 0.0 }
 0x1b9   : > { %v4265_v26 = vpop.f32.mrb[3].mxu1  ;;  %v3468_v27 = vpop.f32.mrb[2].mxu0  ;;  %v1839_v49 = vmax.f32 %v1584_v25, 0.0 }
 0x1ba   : > { %v1842_v29 = vmax.f32 %v3468_v27, 0.0  ;;  %v1587_v30 = vpop.f32.mrb[3].mxu0 }
 0x1bb   : > { %v1840_v31 = vmax.f32 %v1587_v30, 0.0 }
 0x1bc   : > { %v1904_v32 = vpack.c.bf16 %v1842_v29, %v1841_v28 }
 0x1bd   : > { %v1903_v33 = vpack.c.bf16 %v1840_v31, %v1839_v49 }
 0x1be   : > { %v4267_v34 = vpop.f32.mrb[4].mxu1 }
 0x1bf   : > { %v4269_v35 = vpop.f32.mrb[5].mxu1  ;;  %v3471_v36 = vpop.f32.mrb[4].mxu0  ;;  %3545 = vmatprep.mubr.bf16.mxu1 %v1903_v33 }
 0x1c0   : > { %v4271_v37 = vpop.f32.mrb[6].mxu1  ;;  %v1600_v38 = vpop.f32.mrb[5].mxu0  ;;  %3546 = vmatmul.mubr.bf16.vlgmr.msra.gmra.mrb[32].mxu1 %v1904_v32  ;;  %v1845_v41 = vmax.f32 %v3471_v36, 0.0 }
 0x1c1   : > { %v4273_v39 = vpop.f32.mrb[7].mxu1  ;;  %v3472_v40 = vpop.f32.mrb[6].mxu0  ;;  %v1843_v44 = vmax.f32 %v1600_v38, 0.0 }
 0x1c2   : > { %v1846_v42 = vmax.f32 %v3472_v40, 0.0  ;;  %v1603_v43 = vpop.f32.mrb[7].mxu0 }
 0x1c3   : > { %v1844_v45 = vmax.f32 %v1603_v43, 0.0 }
 0x1c4   : > { %v1906_v46 = vpack.c.bf16 %v1846_v42, %v1845_v41 }
 0x1c5   : > { %v1905_v47 = vpack.c.bf16 %v1844_v45, %v1843_v44 }
 0x1c6   : > { %v4275_v48 = vpop.f32.mrb[8].mxu1 }
 0x1c7   : > { %v4277_v50 = vpop.f32.mrb[9].mxu1  ;;  %v3475_v51 = vpop.f32.mrb[8].mxu0  ;;  %3549 = vmatprep.mubr.bf16.mxu1 %v1905_v47 }
 0x1c8   : > { %v4279_v52 = vpop.f32.mrb[10].mxu1  ;;  %v1616_v53 = vpop.f32.mrb[9].mxu0  ;;  %3550 = vmatmul.mubr.bf16.gmra.mrb[36].mxu1 %v1906_v46  ;;  %v1849_v56 = vmax.f32 %v3475_v51, 0.0 }
 0x1c9   : > { %v4281_v54 = vpop.f32.mrb[11].mxu1  ;;  %v3476_v55 = vpop.f32.mrb[10].mxu0  ;;  %v1847_v59 = vmax.f32 %v1616_v53, 0.0 }
 0x1ca   : > { %v1850_v57 = vmax.f32 %v3476_v55, 0.0  ;;  %v1619_v58 = vpop.f32.mrb[11].mxu0 }
 0x1cb   : > { %v1848_v60 = vmax.f32 %v1619_v58, 0.0 }
 0x1cc   : > { %v1908_v61 = vpack.c.bf16 %v1850_v57, %v1849_v56 }
 0x1cd   : > { %v1907_v62 = vpack.c.bf16 %v1848_v60, %v1847_v59 }
 0x1ce   : > { %v4283_v63 = vpop.f32.mrb[12].mxu1 }
 0x1cf   : > { %v4285_v0 = vpop.f32.mrb[13].mxu1  ;;  %v3479_v1 = vpop.f32.mrb[12].mxu0  ;;  %3553 = vmatprep.mubr.bf16.mxu1 %v1907_v62 }
 0x1d0   : > { %v4287_v2 = vpop.f32.mrb[14].mxu1  ;;  %v1632_v3 = vpop.f32.mrb[13].mxu0  ;;  %3554 = vmatmul.mubr.bf16.gmra.mrb[40].mxu1 %v1908_v61  ;;  %v1853_v5 = vmax.f32 %v3479_v1, 0.0 }
 0x1d1   : > { %v4289_v4 = vpop.f32.mrb[15].mxu1  ;;  %v3480_v6 = vpop.f32.mrb[14].mxu0  ;;  %v1851_v8 = vmax.f32 %v1632_v3, 0.0 }
 0x1d2   : > { %v1854_v11 = vmax.f32 %v3480_v6, 0.0  ;;  %v1635_v7 = vpop.f32.mrb[15].mxu0 }
 0x1d3   : > { %v1852_v9 = vmax.f32 %v1635_v7, 0.0 }
 0x1d4   : > { %v1910_v10 = vpack.c.bf16 %v1854_v11, %v1853_v5 }
 0x1d5   : > { %v1909_v12 = vpack.c.bf16 %v1852_v9, %v1851_v8 }
 0x1d6   : > { %v4291_v13 = vpop.f32.mrb[16].mxu1 }
 0x1d7   : > { %v4293_v14 = vpop.f32.mrb[17].mxu1  ;;  %v3483_v15 = vpop.f32.mrb[16].mxu0  ;;  %3557 = vmatprep.mubr.bf16.mxu1 %v1909_v12 }
 0x1d8   : > { %v4295_v16 = vpop.f32.mrb[18].mxu1  ;;  %v1648_v17 = vpop.f32.mrb[17].mxu0  ;;  %3558 = vmatmul.mubr.bf16.gmra.mrb[44].mxu1 %v1910_v10  ;;  %v1857_v20 = vmax.f32 %v3483_v15, 0.0 }
 0x1d9   : > { %v4297_v18 = vpop.f32.mrb[19].mxu1  ;;  %v3484_v19 = vpop.f32.mrb[18].mxu0  ;;  %v1855_v27 = vmax.f32 %v1648_v17, 0.0 }
 0x1da   : > { %v1858_v23 = vmax.f32 %v3484_v19, 0.0  ;;  %v1651_v25 = vpop.f32.mrb[19].mxu0 }
 0x1db   : > { %v1856_v28 = vmax.f32 %v1651_v25, 0.0 }
 0x1dc   : > { %v1912_v29 = vpack.c.bf16 %v1858_v23, %v1857_v20 }
 0x1dd   : > { %v1911_v30 = vpack.c.bf16 %v1856_v28, %v1855_v27 }
 0x1de   : > { %v4299_v49 = vpop.f32.mrb[20].mxu1 }
 0x1df   : > { %v4301_v31 = vpop.f32.mrb[21].mxu1  ;;  %v3487_v32 = vpop.f32.mrb[20].mxu0  ;;  %3561 = vmatprep.mubr.bf16.mxu1 %v1911_v30 }
 0x1e0   : > { %v4303_v33 = vpop.f32.mrb[22].mxu1  ;;  %v1664_v36 = vpop.f32.mrb[21].mxu0  ;;  %3562 = vmatmul.mubr.bf16.gmra.mrb[48].mxu1 %v1912_v29  ;;  %v1861_v41 = vmax.f32 %v3487_v32, 0.0 }
 0x1e1   : > { %v4305_v38 = vpop.f32.mrb[23].mxu1  ;;  %v3488_v40 = vpop.f32.mrb[22].mxu0  ;;  %v1859_v44 = vmax.f32 %v1664_v36, 0.0 }
 0x1e2   : > { %v1862_v42 = vmax.f32 %v3488_v40, 0.0  ;;  %v1667_v43 = vpop.f32.mrb[23].mxu0 }
 0x1e3   : > { %v1860_v45 = vmax.f32 %v1667_v43, 0.0 }
 0x1e4   : > { %v1914_v46 = vpack.c.bf16 %v1862_v42, %v1861_v41 }
 0x1e5   : > { %v1913_v47 = vpack.c.bf16 %v1860_v45, %v1859_v44 }
 0x1e6   : > { %v4307_v51 = vpop.f32.mrb[24].mxu1 }
 0x1e7   : > { %v4309_v53 = vpop.f32.mrb[25].mxu1  ;;  %v3491_v55 = vpop.f32.mrb[24].mxu0  ;;  %3565 = vmatprep.mubr.bf16.mxu1 %v1913_v47 }
 0x1e8   : > { %v4311_v56 = vpop.f32.mrb[26].mxu1  ;;  %v1680_v57 = vpop.f32.mrb[25].mxu0  ;;  %3566 = vmatmul.mubr.bf16.gmra.mrb[52].mxu1 %v1914_v46  ;;  %v1865_v60 = vmax.f32 %v3491_v55, 0.0 }
 0x1e9   : > { %v4313_v58 = vpop.f32.mrb[27].mxu1  ;;  %v3492_v59 = vpop.f32.mrb[26].mxu0  ;;  %v1863_v1 = vmax.f32 %v1680_v57, 0.0 }
 0x1ea   : > { %v1866_v61 = vmax.f32 %v3492_v59, 0.0  ;;  %v1683_v62 = vpop.f32.mrb[27].mxu0 }
 0x1eb   : > { %v1864_v3 = vmax.f32 %v1683_v62, 0.0 }
 0x1ec   : > { %v1916_v6 = vpack.c.bf16 %v1866_v61, %v1865_v60 }
 0x1ed   : > { %v1915_v5 = vpack.c.bf16 %v1864_v3, %v1863_v1 }
 0x1ee   : > { %v4315_v11 = vpop.f32.mrb[28].mxu1 }
 0x1ef   : > { %v4317_v7 = vpop.f32.mrb[29].mxu1  ;;  %v3495_v8 = vpop.f32.mrb[28].mxu0  ;;  %3569 = vmatprep.mubr.bf16.mxu1 %v1915_v5 }
 0x1f0   : > { %v4319_v9 = vpop.f32.mrb[30].mxu1  ;;  %v1696_v10 = vpop.f32.mrb[29].mxu0  ;;  %3570 = vmatmul.mubr.bf16.gmra.mrb[56].mxu1 %v1916_v6  ;;  %v1869_v17 = vmax.f32 %v3495_v8, 0.0 }
 0x1f1   : > { %v4321_v12 = vpop.f32.mrb[31].mxu1  ;;  %v3496_v15 = vpop.f32.mrb[30].mxu0  ;;  %v1867_v23 = vmax.f32 %v1696_v10, 0.0 }
 0x1f2   : > { %v1870_v19 = vmax.f32 %v3496_v15, 0.0  ;;  %v1699_v20 = vpop.f32.mrb[31].mxu0 }
 0x1f3   : > { %v1868_v25 = vmax.f32 %v1699_v20, 0.0 }
 0x1f4   : > { %v1918_v27 = vpack.c.bf16 %v1870_v19, %v1869_v17 }
 0x1f5   : > { %v1917_v28 = vpack.c.bf16 %v1868_v25, %v1867_v23 }
 0x1f7   : > { %v3499_v29 = vpop.f32.mrb[32].mxu0  ;;  %3573 = vmatprep.mubr.bf16.mxu1 %v1917_v28 }
 0x1f8   : > { %v1721_v30 = vadd.f32 %v3499_v29, %v4259_v21  ;;  %v1712_v32 = vpop.f32.mrb[33].mxu0  ;;  %3574 = vmatmul.mubr.bf16.gmra.mrb[60].mxu1 %v1918_v27 }
 0x1f9   : > { %v1713_v36 = vadd.f32 %v1712_v32, %v4261_v22  ;;  %v3500_v40 = vpop.f32.mrb[34].mxu0 }
 0x1fa   : > { %v1724_v41 = vadd.f32 %v3500_v40, %v4263_v24  ;;  %v1715_v42 = vpop.f32.mrb[35].mxu0  ;;  %v1873_v44 = vmax.f32 %v1721_v30, 0.0 }
 0x1fb   : > { %v1716_v43 = vadd.f32 %v1715_v42, %v4265_v26  ;;  %v1871_v46 = vmax.f32 %v1713_v36, 0.0 }
 0x1fc   : > { %v1874_v45 = vmax.f32 %v1724_v41, 0.0 }
 0x1fd   : > { %v1872_v47 = vmax.f32 %v1716_v43, 0.0 }
 0x1fe   : > { %v1920_v55 = vpack.c.bf16 %v1874_v45, %v1873_v44 }
 0x1ff   : > { %v1919_v57 = vpack.c.bf16 %v1872_v47, %v1871_v46  ;;  %v3503_v59 = vpop.f32.mrb[36].mxu0 }
 0x200   : > { %v1737_v60 = vadd.f32 %v3503_v59, %v4267_v34  ;;  %v1728_v21 = vpop.f32.mrb[37].mxu0 }
 0x201   : > { %v1729_v61 = vadd.f32 %v1728_v21, %v4269_v35  ;;  %v3504_v62 = vpop.f32.mrb[38].mxu0  ;;  %3577 = vmatprep.mubr.bf16.mxu1 %v1919_v57 }
 0x202   : > { %v1740_v22 = vadd.f32 %v3504_v62, %v4271_v37  ;;  %v1731_v24 = vpop.f32.mrb[39].mxu0  ;;  %3578 = vmatmul.mubr.bf16.gmra.mrb[64].mxu1 %v1920_v55  ;;  %v1877_v1 = vmax.f32 %v1737_v60, 0.0 }
 0x203   : > { %v1732_v26 = vadd.f32 %v1731_v24, %v4273_v39  ;;  %v1875_v6 = vmax.f32 %v1729_v61, 0.0 }
 0x204   : > { %v1878_v3 = vmax.f32 %v1740_v22, 0.0 }
 0x205   : > { %v1876_v5 = vmax.f32 %v1732_v26, 0.0 }
 0x206   : > { %v1922_v8 = vpack.c.bf16 %v1878_v3, %v1877_v1 }
 0x207   : > { %v1921_v10 = vpack.c.bf16 %v1876_v5, %v1875_v6  ;;  %v3507_v15 = vpop.f32.mrb[40].mxu0 }
 0x208   : > { %v1753_v34 = vadd.f32 %v3507_v15, %v4275_v48  ;;  %v1744_v17 = vpop.f32.mrb[41].mxu0 }
 0x209   : > { %v1745_v35 = vadd.f32 %v1744_v17, %v4277_v50  ;;  %v3508_v19 = vpop.f32.mrb[42].mxu0  ;;  %3581 = vmatprep.mubr.bf16.mxu1 %v1921_v10 }
 0x20a   : > { %v1756_v37 = vadd.f32 %v3508_v19, %v4279_v52  ;;  %v1747_v20 = vpop.f32.mrb[43].mxu0  ;;  %3582 = vmatmul.mubr.bf16.gmra.mrb[68].mxu1 %v1922_v8  ;;  %v1881_v23 = vmax.f32 %v1753_v34, 0.0 }
 0x20b   : > { %v1748_v39 = vadd.f32 %v1747_v20, %v4281_v54  ;;  %v1879_v27 = vmax.f32 %v1745_v35, 0.0 }
 0x20c   : > { %v1882_v25 = vmax.f32 %v1756_v37, 0.0 }
 0x20d   : > { %v1880_v28 = vmax.f32 %v1748_v39, 0.0 }
 0x20e   : > { %v1924_v29 = vpack.c.bf16 %v1882_v25, %v1881_v23 }
 0x20f   : > { %v1923_v30 = vpack.c.bf16 %v1880_v28, %v1879_v27  ;;  %v3511_v32 = vpop.f32.mrb[44].mxu0 }
 0x210   : > { %v1769_v48 = vadd.f32 %v3511_v32, %v4283_v63  ;;  %v1760_v36 = vpop.f32.mrb[45].mxu0 }
 0x211   : > { %v1761_v50 = vadd.f32 %v1760_v36, %v4285_v0  ;;  %v3512_v40 = vpop.f32.mrb[46].mxu0  ;;  %3585 = vmatprep.mubr.bf16.mxu1 %v1923_v30 }
 0x212   : > { %v1772_v52 = vadd.f32 %v3512_v40, %v4287_v2  ;;  %v1763_v41 = vpop.f32.mrb[47].mxu0  ;;  %3586 = vmatmul.mubr.bf16.gmra.mrb[72].mxu1 %v1924_v29  ;;  %v1885_v42 = vmax.f32 %v1769_v48, 0.0 }
 0x213   : > { %v1764_v54 = vadd.f32 %v1763_v41, %v4289_v4  ;;  %v1883_v44 = vmax.f32 %v1761_v50, 0.0 }
 0x214   : > { %v1886_v43 = vmax.f32 %v1772_v52, 0.0 }
 0x215   : > { %v1884_v45 = vmax.f32 %v1764_v54, 0.0 }
 0x216   : > { %v1926_v46 = vpack.c.bf16 %v1886_v43, %v1885_v42 }
 0x217   : > { %v1925_v47 = vpack.c.bf16 %v1884_v45, %v1883_v44  ;;  %v3515_v55 = vpop.f32.mrb[48].mxu0 }
 0x218   : > { %v1785_v63 = vadd.f32 %v3515_v55, %v4291_v13  ;;  %v1776_v57 = vpop.f32.mrb[49].mxu0 }
 0x219   : > { %v1777_v0 = vadd.f32 %v1776_v57, %v4293_v14  ;;  %v3516_v59 = vpop.f32.mrb[50].mxu0  ;;  %3589 = vmatprep.mubr.bf16.mxu1 %v1925_v47 }
 0x21a   : > { %v1788_v2 = vadd.f32 %v3516_v59, %v4295_v16  ;;  %v1779_v60 = vpop.f32.mrb[51].mxu0  ;;  %3590 = vmatmul.mubr.bf16.gmra.mrb[76].mxu1 %v1926_v46  ;;  %v1889_v21 = vmax.f32 %v1785_v63, 0.0 }
 0x21b   : > { %v1780_v4 = vadd.f32 %v1779_v60, %v4297_v18  ;;  %v1887_v62 = vmax.f32 %v1777_v0, 0.0 }
 0x21c   : > { %v1890_v61 = vmax.f32 %v1788_v2, 0.0 }
 0x21d   : > { %v1888_v22 = vmax.f32 %v1780_v4, 0.0 }
 0x21e   : > { %v1928_v24 = vpack.c.bf16 %v1890_v61, %v1889_v21 }
 0x21f   : > { %v1927_v26 = vpack.c.bf16 %v1888_v22, %v1887_v62  ;;  %v3519_v1 = vpop.f32.mrb[52].mxu0 }
 0x220   : > { %v1801_v13 = vadd.f32 %v3519_v1, %v4299_v49  ;;  %v1792_v3 = vpop.f32.mrb[53].mxu0 }
 0x221   : > { %v1793_v14 = vadd.f32 %v1792_v3, %v4301_v31  ;;  %v3520_v6 = vpop.f32.mrb[54].mxu0  ;;  %3593 = vmatprep.mubr.bf16.mxu1 %v1927_v26 }
 0x222   : > { %v1804_v16 = vadd.f32 %v3520_v6, %v4303_v33  ;;  %v1795_v5 = vpop.f32.mrb[55].mxu0  ;;  %3594 = vmatmul.mubr.bf16.gmra.mrb[80].mxu1 %v1928_v24  ;;  %v1893_v8 = vmax.f32 %v1801_v13, 0.0 }
 0x223   : > { %v1796_v18 = vadd.f32 %v1795_v5, %v4305_v38  ;;  %v1891_v15 = vmax.f32 %v1793_v14, 0.0 }
 0x224   : > { %v1894_v10 = vmax.f32 %v1804_v16, 0.0 }
 0x225   : > { %v1892_v34 = vmax.f32 %v1796_v18, 0.0 }
 0x226   : > { %v1930_v17 = vpack.c.bf16 %v1894_v10, %v1893_v8 }
 0x227   : > { %v1929_v35 = vpack.c.bf16 %v1892_v34, %v1891_v15  ;;  %v3523_v19 = vpop.f32.mrb[56].mxu0 }
 0x228   : > { %v1817_v49 = vadd.f32 %v3523_v19, %v4307_v51  ;;  %v1808_v37 = vpop.f32.mrb[57].mxu0 }
 0x229   : > { %v1809_v31 = vadd.f32 %v1808_v37, %v4309_v53  ;;  %v3524_v20 = vpop.f32.mrb[58].mxu0  ;;  %3597 = vmatprep.mubr.bf16.mxu1 %v1929_v35 }
 0x22a   : > { %v1820_v33 = vadd.f32 %v3524_v20, %v4311_v56  ;;  %v1811_v39 = vpop.f32.mrb[59].mxu0  ;;  %3598 = vmatmul.mubr.bf16.gmra.mrb[84].mxu1 %v1930_v17  ;;  %v1897_v23 = vmax.f32 %v1817_v49, 0.0 }
 0x22b   : > { %v1812_v38 = vadd.f32 %v1811_v39, %v4313_v58  ;;  %v1895_v27 = vmax.f32 %v1809_v31, 0.0 }
 0x22c   : > { %v1898_v25 = vmax.f32 %v1820_v33, 0.0 }
 0x22d   : > { %v1896_v28 = vmax.f32 %v1812_v38, 0.0 }
 0x22e   : > { %v1932_v29 = vpack.c.bf16 %v1898_v25, %v1897_v23 }
 0x22f   : > { %v1931_v30 = vpack.c.bf16 %v1896_v28, %v1895_v27  ;;  %v3527_v32 = vpop.f32.mrb[60].mxu0 }
 0x230   : > { %v1833_v51 = vadd.f32 %v3527_v32, %v4315_v11  ;;  %v1824_v48 = vpop.f32.mrb[61].mxu0  ;;  %v4358_v11 = vld [vmem:[%s4642_s5] ss:$0 sm:$0xff] }
 0x231   : > { %v1825_v53 = vadd.f32 %v1824_v48, %v4317_v7  ;;  %v3528_v36 = vpop.f32.mrb[62].mxu0  ;;  %3601 = vmatprep.mubr.bf16.mxu1 %v1931_v30 }
 0x232   : > { %v1836_v56 = vadd.f32 %v3528_v36, %v4319_v9  ;;  %v1827_v50 = vpop.f32.mrb[63].mxu0  ;;  %3602 = vmatmul.mubr.bf16.gmra.mrb[88].mxu1 %v1932_v29  ;;  %v1901_v40 = vmax.f32 %v1833_v51, 0.0 }
 0x233   : > { %v1828_v58 = vadd.f32 %v1827_v50, %v4321_v12  ;;  %v1899_v41 = vmax.f32 %v1825_v53, 0.0 }
 0x234   : > { %v1902_v52 = vmax.f32 %v1836_v56, 0.0 }
 0x235   : > { %v1900_v54 = vmax.f32 %v1828_v58, 0.0 }
 0x236   : > { %v1934_v42 = vpack.c.bf16 %v1902_v52, %v1901_v40 }
 0x237   : > { %v1933_v43 = vpack.c.bf16 %v1900_v54, %v1899_v41 }
 0x239   : > { %3605 = vmatprep.mubr.bf16.mxu1 %v1933_v43 }
 0x23a   : > { %3606 = vmatmul.mubr.bf16.gmra.mrb[92].mxu1 %v1934_v42 }
 0x293   : > { %v3547_v7 = vpop.f32.mrb[32].mxu1 }
 0x294   : > { %v2049_v9 = vadd.f32 %v3547_v7, %v4358_v11  ;;  %v2040_v44 = vpop.f32.mrb[33].mxu1 }
 0x295   : > { %v2041_v45 = vadd.f32 %v4358_v11, %v2040_v44  ;;  %v3548_v12 = vpop.f32.mrb[34].mxu1 }
 0x296   : > { %v2297_v46 = vmax.f32 %v2049_v9, 0.0  ;;  %v2052_v47 = vadd.f32 %v3548_v12, %v4358_v11  ;;  %v2043_v55 = vpop.f32.mrb[35].mxu1 }
 0x297   : > { %v2295_v63 = vmax.f32 %v2041_v45, 0.0  ;;  %v2044_v57 = vadd.f32 %v4358_v11, %v2043_v55 }
 0x298   : > { %v2371_v0 = vrot.slane %v2297_v46, 4  ;;  %v2298_v59 = vmax.f32 %v2052_v47, 0.0 }
 0x299   : > { %v2359_v2 = vrot.slane %v2295_v63, 4  ;;  %v2296_v60 = vmax.f32 %v2044_v57, 0.0 }
 0x29a   : > { %v2372_v4 = vadd.f32 %v2371_v0, %v2297_v46  ;;  %v2377_v21 = vrot.slane %v2298_v59, 4 }
 0x29b   : > { %v2360_v61 = vadd.f32 %v2359_v2, %v2295_v63  ;;  %v2365_v62 = vrot.slane %v2296_v60, 4  ;;  %v3551_v22 = vpop.f32.mrb[36].mxu1 }
 0x29c   : > { %v2373_v24 = vrot.slane %v2372_v4, 2  ;;  %v2378_v26 = vadd.f32 %v2377_v21, %v2298_v59  ;;  %v2065_v1 = vadd.f32 %v3551_v22, %v4358_v11  ;;  %v2056_v13 = vpop.f32.mrb[37].mxu1 }
 0x29d   : > { %v2361_v3 = vrot.slane %v2360_v61, 2  ;;  %v2366_v14 = vadd.f32 %v2365_v62, %v2296_v60  ;;  %v2057_v6 = vadd.f32 %v4358_v11, %v2056_v13  ;;  %v3552_v16 = vpop.f32.mrb[38].mxu1 }
 0x29e   : > { %v2374_v5 = vadd.f32 %v2373_v24, %v2372_v4  ;;  %v2379_v18 = vrot.slane %v2378_v26, 2  ;;  %v2301_v8 = vmax.f32 %v2065_v1, 0.0  ;;  %v2068_v10 = vadd.f32 %v3552_v16, %v4358_v11  ;;  %v2059_v15 = vpop.f32.mrb[39].mxu1 }
 0x29f   : > { %v2362_v34 = vadd.f32 %v2361_v3, %v2360_v61  ;;  %v2367_v17 = vrot.slane %v2366_v14, 2  ;;  %v2299_v35 = vmax.f32 %v2057_v6, 0.0  ;;  %v2060_v19 = vadd.f32 %v4358_v11, %v2059_v15 }
 0x2a0   : > { %v2375_v49 = vrot.slane %v2374_v5, 1  ;;  %v2380_v37 = vadd.f32 %v2379_v18, %v2378_v26  ;;  %v2395_v31 = vrot.slane %v2301_v8, 4  ;;  %v2302_v20 = vmax.f32 %v2068_v10, 0.0 }
 0x2a1   : > { %v2363_v33 = vrot.slane %v2362_v34, 1  ;;  %v2368_v39 = vadd.f32 %v2367_v17, %v2366_v14  ;;  %v2383_v38 = vrot.slane %v2299_v35, 4  ;;  %v2300_v23 = vmax.f32 %v2060_v19, 0.0 }
 0x2a2   : > { %v2376_v25 = vadd.f32 %v2375_v49, %v2374_v5  ;;  %v2381_v27 = vrot.slane %v2380_v37, 1  ;;  %v2396_v28 = vadd.f32 %v2395_v31, %v2301_v8  ;;  %v2401_v29 = vrot.slane %v2302_v20, 4 }
 0x2a3   : > { %v2364_v30 = vadd.f32 %v2363_v33, %v2362_v34  ;;  %v2369_v32 = vrot.slane %v2368_v39, 1  ;;  %v2384_v51 = vadd.f32 %v2383_v38, %v2299_v35  ;;  %v2389_v48 = vrot.slane %v2300_v23, 4  ;;  %v3555_v53 = vpop.f32.mrb[40].mxu1 }
 0x2a4   : > { %v2745_v36 = vmul.f32 0.125, %v2376_v25  ;;  %v2382_v56 = vadd.f32 %v2381_v27, %v2380_v37  ;;  %v2397_v50 = vrot.slane %v2396_v28, 2  ;;  %v2402_v58 = vadd.f32 %v2401_v29, %v2302_v20  ;;  %v2072_v40 = vpop.f32.mrb[41].mxu1 }
 0x2a5   : > { %v2743_v52 = vmul.f32 0.125, %v2364_v30  ;;  %v2370_v41 = vadd.f32 %v2369_v32, %v2368_v39  ;;  %v2385_v54 = vrot.slane %v2384_v51, 2  ;;  %v2390_v42 = vadd.f32 %v2389_v48, %v2300_v23  ;;  %v3556_v43 = vpop.f32.mrb[42].mxu1 }
 0x2a6   : > { %v2746_v7 = vmul.f32 0.125, %v2382_v56  ;;  %v2398_v9 = vadd.f32 %v2397_v50, %v2396_v28  ;;  %v2403_v44 = vrot.slane %v2402_v58, 2  ;;  %v2081_v45 = vadd.f32 %v3555_v53, %v4358_v11  ;;  %v2075_v12 = vpop.f32.mrb[43].mxu1 }
 0x2a7   : > { %v2744_v46 = vmul.f32 0.125, %v2370_v41  ;;  %v2386_v47 = vadd.f32 %v2385_v54, %v2384_v51  ;;  %v2391_v55 = vrot.slane %v2390_v42, 2  ;;  %v2073_v63 = vadd.f32 %v4358_v11, %v2072_v40 }
 0x2a8   : > { %v2399_v57 = vrot.slane %v2398_v9, 1  ;;  %v2404_v0 = vadd.f32 %v2403_v44, %v2402_v58  ;;  %v2305_v59 = vmax.f32 %v2081_v45, 0.0  ;;  %v2084_v2 = vadd.f32 %v3556_v43, %v4358_v11 }
 0x2a9   : > { %v2872_v60 = vsel %vm2871_vm5, %v2744_v46, %v2743_v52  ;;  %v2387_v4 = vrot.slane %v2386_v47, 1  ;;  %v2392_v21 = vadd.f32 %v2391_v55, %v2390_v42  ;;  %v2303_v61 = vmax.f32 %v2073_v63, 0.0 }
 0x2aa   : > { %v2874_v62 = vsel %vm2873_vm3, %v2745_v36, %v2872_v60  ;;  %v2400_v22 = vadd.f32 %v2399_v57, %v2398_v9  ;;  %v2405_v24 = vrot.slane %v2404_v0, 1  ;;  %v2419_v26 = vrot.slane %v2305_v59, 4 }
 0x2ab   : > { %v2388_v1 = vadd.f32 %v2387_v4, %v2386_v47  ;;  %v2876_v13 = vsel %vm2875_vm9, %v2746_v7, %v2874_v62  ;;  %v2393_v3 = vrot.slane %v2392_v21, 1  ;;  %v2407_v14 = vrot.slane %v2303_v61, 4  ;;  %v3559_v6 = vpop.f32.mrb[44].mxu1 }
 0x2ac   : > { %v2749_v16 = vmul.f32 0.125, %v2400_v22  ;;  %v2406_v5 = vadd.f32 %v2405_v24, %v2404_v0  ;;  %v2420_v18 = vadd.f32 %v2419_v26, %v2305_v59  ;;  %v2306_v8 = vmax.f32 %v2084_v2, 0.0  ;;  %v2088_v10 = vpop.f32.mrb[45].mxu1 }
 0x2ad   : > { %v2747_v15 = vmul.f32 0.125, %v2388_v1  ;;  %v2394_v34 = vadd.f32 %v2393_v3, %v2392_v21  ;;  %v2408_v17 = vadd.f32 %v2407_v14, %v2303_v61  ;;  %v2076_v35 = vadd.f32 %v4358_v11, %v2075_v12  ;;  %v3560_v19 = vpop.f32.mrb[46].mxu1 }
 0x2ae   : > { %v2750_v49 = vmul.f32 0.125, %v2406_v5  ;;  %v2421_v37 = vrot.slane %v2420_v18, 2  ;;  %v2425_v31 = vrot.slane %v2306_v8, 4  ;;  %v2097_v20 = vadd.f32 %v3559_v6, %v4358_v11  ;;  %v2091_v33 = vpop.f32.mrb[47].mxu1 }
 0x2af   : > { %v2878_v39 = vsel %vm2877_vm10, %v2747_v15, %v2876_v13  ;;  %v2748_v38 = vmul.f32 0.125, %v2394_v34  ;;  %v2409_v23 = vrot.slane %v2408_v17, 2  ;;  %v2304_v25 = vmax.f32 %v2076_v35, 0.0 }
 0x2b0   : > { %v2422_v27 = vadd.f32 %v2421_v37, %v2420_v18  ;;  %v2426_v28 = vadd.f32 %v2425_v31, %v2306_v8  ;;  %v2309_v29 = vmax.f32 %v2097_v20, 0.0  ;;  %v2089_v30 = vadd.f32 %v4358_v11, %v2088_v10 }
 0x2b1   : > { %v2880_v32 = vsel %vm2879_vm11, %v2748_v38, %v2878_v39  ;;  %v2410_v51 = vadd.f32 %v2409_v23, %v2408_v17  ;;  %v2413_v48 = vrot.slane %v2304_v25, 4  ;;  %v2100_v53 = vadd.f32 %v3560_v19, %v4358_v11 }
 0x2b2   : > { %v2882_v36 = vsel %vm2881_vm12, %v2749_v16, %v2880_v32  ;;  %v2423_v56 = vrot.slane %v2422_v27, 1  ;;  %v2427_v50 = vrot.slane %v2426_v28, 2  ;;  %v2443_v58 = vrot.slane %v2309_v29, 4 }
 0x2b3   : > { %v2884_v40 = vsel %vm2883_vm13, %v2750_v49, %v2882_v36  ;;  %v2411_v52 = vrot.slane %v2410_v51, 1  ;;  %v2414_v41 = vadd.f32 %v2413_v48, %v2304_v25  ;;  %v2307_v54 = vmax.f32 %v2089_v30, 0.0  ;;  %v3563_v42 = vpop.f32.mrb[48].mxu1 }
 0x2b4   : > { %2942 = vst [vmem:[%s4385_s14] sm:$0xff] %v2884_v40  ;;  %v2424_v43 = vadd.f32 %v2423_v56, %v2422_v27  ;;  %v2428_v7 = vadd.f32 %v2427_v50, %v2426_v28  ;;  %v2444_v9 = vadd.f32 %v2443_v58, %v2309_v29  ;;  %v2310_v44 = vmax.f32 %v2100_v53, 0.0  ;;  %v2104_v45 = vpop.f32.mrb[49].mxu1 }
 0x2b5   : > { %v2412_v12 = vadd.f32 %v2411_v52, %v2410_v51  ;;  %v2415_v46 = vrot.slane %v2414_v41, 2  ;;  %v2431_v47 = vrot.slane %v2307_v54, 4  ;;  %v2092_v55 = vadd.f32 %v4358_v11, %v2091_v33  ;;  %v3564_v63 = vpop.f32.mrb[50].mxu1 }
 0x2b6   : > { %v2753_v57 = vmul.f32 0.125, %v2424_v43  ;;  %v2429_v0 = vrot.slane %v2428_v7, 1  ;;  %v2445_v59 = vrot.slane %v2444_v9, 2  ;;  %v2449_v2 = vrot.slane %v2310_v44, 4  ;;  %v2107_v60 = vpop.f32.mrb[51].mxu1 }
 0x2b7   : > { %v2751_v4 = vmul.f32 0.125, %v2412_v12  ;;  %v2416_v21 = vadd.f32 %v2415_v46, %v2414_v41  ;;  %v2432_v61 = vadd.f32 %v2431_v47, %v2307_v54  ;;  %v2308_v62 = vmax.f32 %v2092_v55, 0.0 }
 0x2b8   : > { %v2430_v22 = vadd.f32 %v2429_v0, %v2428_v7  ;;  %v2446_v24 = vadd.f32 %v2445_v59, %v2444_v9  ;;  %v2450_v26 = vadd.f32 %v2449_v2, %v2310_v44  ;;  %v2113_v1 = vadd.f32 %v3563_v42, %v4358_v11 }
 0x2b9   : > { %v2417_v13 = vrot.slane %v2416_v21, 1  ;;  %v2433_v3 = vrot.slane %v2432_v61, 2  ;;  %v2437_v14 = vrot.slane %v2308_v62, 4  ;;  %v2105_v6 = vadd.f32 %v4358_v11, %v2104_v45 }
 0x2ba   : > { %v2754_v16 = vmul.f32 0.125, %v2430_v22  ;;  %v2447_v5 = vrot.slane %v2446_v24, 1  ;;  %v2451_v18 = vrot.slane %v2450_v26, 2  ;;  %v2313_v8 = vmax.f32 %v2113_v1, 0.0 }
 0x2bb   : > { %v2418_v10 = vadd.f32 %v2417_v13, %v2416_v21  ;;  %v2434_v15 = vadd.f32 %v2433_v3, %v2432_v61  ;;  %v2438_v34 = vadd.f32 %v2437_v14, %v2308_v62  ;;  %v2311_v17 = vmax.f32 %v2105_v6, 0.0  ;;  %v3567_v35 = vpop.f32.mrb[52].mxu1 }
 0x2bc   : > { %v2448_v19 = vadd.f32 %v2447_v5, %v2446_v24  ;;  %v2452_v49 = vadd.f32 %v2451_v18, %v2450_v26  ;;  %v2467_v37 = vrot.slane %v2313_v8, 4  ;;  %v2116_v31 = vadd.f32 %v3564_v63, %v4358_v11  ;;  %v2120_v20 = vpop.f32.mrb[53].mxu1 }
 0x2bd   : > { %v2752_v33 = vmul.f32 0.125, %v2418_v10  ;;  %v2435_v39 = vrot.slane %v2434_v15, 1  ;;  %v2439_v38 = vrot.slane %v2438_v34, 2  ;;  %v2455_v23 = vrot.slane %v2311_v17, 4  ;;  %v3568_v25 = vpop.f32.mrb[54].mxu1 }
 0x2be   : > { %v2757_v27 = vmul.f32 0.125, %v2448_v19  ;;  %v2453_v28 = vrot.slane %v2452_v49, 1  ;;  %v2468_v29 = vadd.f32 %v2467_v37, %v2313_v8  ;;  %v2314_v30 = vmax.f32 %v2116_v31, 0.0  ;;  %v2123_v32 = vpop.f32.mrb[55].mxu1 }
 0x2bf   : > { %v2885_v51 = vsel %vm2871_vm5, %v2752_v33, %v2751_v4  ;;  %v2436_v48 = vadd.f32 %v2435_v39, %v2434_v15  ;;  %v2440_v53 = vadd.f32 %v2439_v38, %v2438_v34  ;;  %v2456_v36 = vadd.f32 %v2455_v23, %v2311_v17 }
 0x2c0   : > { %v2886_v56 = vsel %vm2873_vm3, %v2753_v57, %v2885_v51  ;;  %v2454_v50 = vadd.f32 %v2453_v28, %v2452_v49  ;;  %v2469_v58 = vrot.slane %v2468_v29, 2  ;;  %v2473_v40 = vrot.slane %v2314_v30, 4 }
 0x2c1   : > { %v2755_v52 = vmul.f32 0.125, %v2436_v48  ;;  %v2887_v41 = vsel %vm2875_vm9, %v2754_v16, %v2886_v56  ;;  %v2441_v54 = vrot.slane %v2440_v53, 1  ;;  %v2457_v42 = vrot.slane %v2456_v36, 2 }
 0x2c2   : > { %v2758_v43 = vmul.f32 0.125, %v2454_v50  ;;  %v2470_v7 = vadd.f32 %v2469_v58, %v2468_v29  ;;  %v2474_v9 = vadd.f32 %v2473_v40, %v2314_v30  ;;  %v2108_v44 = vadd.f32 %v4358_v11, %v2107_v60 }
 0x2c3   : > { %v2888_v45 = vsel %vm2877_vm10, %v2755_v52, %v2887_v41  ;;  %v2442_v12 = vadd.f32 %v2441_v54, %v2440_v53  ;;  %v2458_v46 = vadd.f32 %v2457_v42, %v2456_v36  ;;  %v2129_v47 = vadd.f32 %v3567_v35, %v4358_v11  ;;  %v3571_v55 = vpop.f32.mrb[56].mxu1 }
 0x2c4   : > { %v2471_v63 = vrot.slane %v2470_v7, 1  ;;  %v2475_v57 = vrot.slane %v2474_v9, 2  ;;  %v2312_v0 = vmax.f32 %v2108_v44, 0.0  ;;  %v2121_v59 = vadd.f32 %v4358_v11, %v2120_v20  ;;  %v2136_v2 = vpop.f32.mrb[57].mxu1 }
 0x2c5   : > { %v2756_v4 = vmul.f32 0.125, %v2442_v12  ;;  %v2459_v21 = vrot.slane %v2458_v46, 1  ;;  %v2317_v61 = vmax.f32 %v2129_v47, 0.0  ;;  %v2132_v62 = vadd.f32 %v3568_v25, %v4358_v11  ;;  %v3572_v22 = vpop.f32.mrb[58].mxu1 }
 0x2c6   : > { %v2472_v60 = vadd.f32 %v2471_v63, %v2470_v7  ;;  %v2476_v24 = vadd.f32 %v2475_v57, %v2474_v9  ;;  %v2461_v26 = vrot.slane %v2312_v0, 4  ;;  %v2315_v1 = vmax.f32 %v2121_v59, 0.0  ;;  %v4400_v13 = vpop.f32.mrb[59].mxu1 }
 0x2c7   : > { %v2889_v3 = vsel %vm2879_vm11, %v2756_v4, %v2888_v45  ;;  %v2460_v14 = vadd.f32 %v2459_v21, %v2458_v46  ;;  %v2491_v6 = vrot.slane %v2317_v61, 4  ;;  %v2318_v16 = vmax.f32 %v2132_v62, 0.0 }
 0x2c8   : > { %v2890_v5 = vsel %vm2881_vm12, %v2757_v27, %v2889_v3  ;;  %v2477_v18 = vrot.slane %v2476_v24, 1  ;;  %v2462_v8 = vadd.f32 %v2461_v26, %v2312_v0  ;;  %v2761_v15 = vmul.f32 0.125, %v2472_v60 }
 0x2c9   : > { %v2891_v10 = vsel %vm2883_vm13, %v2758_v43, %v2890_v5  ;;  %v2492_v34 = vadd.f32 %v2491_v6, %v2317_v61  ;;  %v2479_v17 = vrot.slane %v2315_v1, 4  ;;  %v2759_v35 = vmul.f32 0.125, %v2460_v14 }
 0x2ca   : > { %2943 = vst [vmem:[%s4385_s14 + $0x8] sm:$0xff] %v2891_v10  ;;  %v2463_v19 = vrot.slane %v2462_v8, 2  ;;  %v2497_v49 = vrot.slane %v2318_v16, 4  ;;  %v2124_v37 = vadd.f32 %v4358_v11, %v2123_v32  ;;  %v2145_v33 = vadd.f32 %v3571_v55, %v4358_v11 }
 0x2cb   : > { %v2493_v31 = vrot.slane %v2492_v34, 2  ;;  %v2480_v20 = vadd.f32 %v2479_v17, %v2315_v1  ;;  %v2137_v39 = vadd.f32 %v4358_v11, %v2136_v2  ;;  %v3575_v38 = vpop.f32.mrb[60].mxu1  ;;  %v2478_v23 = vadd.f32 %v2477_v18, %v2476_v24 }
 0x2cc   : > { %v2464_v25 = vadd.f32 %v2463_v19, %v2462_v8  ;;  %v2498_v27 = vadd.f32 %v2497_v49, %v2318_v16  ;;  %v2316_v28 = vmax.f32 %v2124_v37, 0.0  ;;  %v2152_v29 = vpop.f32.mrb[61].mxu1  ;;  %v2321_v48 = vmax.f32 %v2145_v33, 0.0 }
 0x2cd   : > { %v2494_v30 = vadd.f32 %v2493_v31, %v2492_v34  ;;  %v2481_v51 = vrot.slane %v2480_v20, 2  ;;  %v2319_v53 = vmax.f32 %v2137_v39, 0.0  ;;  %v3576_v36 = vpop.f32.mrb[62].mxu1  ;;  %v2148_v58 = vadd.f32 %v3572_v22, %v4358_v11 }
 0x2ce   : > { %v2465_v56 = vrot.slane %v2464_v25, 1  ;;  %v2499_v50 = vrot.slane %v2498_v27, 2  ;;  %v2485_v32 = vrot.slane %v2316_v28, 4  ;;  %v4410_v40 = vpop.f32.mrb[63].mxu1  ;;  %v2515_v54 = vrot.slane %v2321_v48, 4 }
 0x2cf   : > { %v2495_v52 = vrot.slane %v2494_v30, 1  ;;  %v2482_v41 = vadd.f32 %v2481_v51, %v2480_v20  ;;  %v2503_v42 = vrot.slane %v2319_v53, 4  ;;  %v2322_v44 = vmax.f32 %v2148_v58, 0.0 }
 0x2d0   : > { %v2466_v43 = vadd.f32 %v2465_v56, %v2464_v25  ;;  %v2500_v7 = vadd.f32 %v2499_v50, %v2498_v27  ;;  %v2486_v9 = vadd.f32 %v2485_v32, %v2316_v28  ;;  %v2516_v46 = vadd.f32 %v2515_v54, %v2321_v48 }
 0x2d1   : > { %v2496_v45 = vadd.f32 %v2495_v52, %v2494_v30  ;;  %v2483_v12 = vrot.slane %v2482_v41, 1  ;;  %v2504_v47 = vadd.f32 %v2503_v42, %v2319_v53  ;;  %v2521_v0 = vrot.slane %v2322_v44, 4 }
 0x2d2   : > { %v2760_v55 = vmul.f32 0.125, %v2466_v43  ;;  %v2501_v63 = vrot.slane %v2500_v7, 1  ;;  %v2487_v57 = vrot.slane %v2486_v9, 2  ;;  %v2762_v59 = vmul.f32 0.125, %v2478_v23 }
 0x2d3   : > { %v2484_v2 = vadd.f32 %v2483_v12, %v2482_v41  ;;  %v2517_v4 = vrot.slane %v2516_v46, 2  ;;  %v2505_v21 = vrot.slane %v2504_v47, 2  ;;  %v2765_v62 = vmul.f32 0.125, %v2496_v45 }
 0x2d4   : > { %v2892_v61 = vsel %vm2871_vm5, %v2760_v55, %v2759_v35  ;;  %v2488_v22 = vadd.f32 %v2487_v57, %v2486_v9  ;;  %v2522_v60 = vadd.f32 %v2521_v0, %v2322_v44  ;;  %v2502_v16 = vadd.f32 %v2501_v63, %v2500_v7 }
 0x2d5   : > { %v2893_v24 = vsel %vm2873_vm3, %v2761_v15, %v2892_v61  ;;  %v2763_v26 = vmul.f32 0.125, %v2484_v2  ;;  %v2518_v1 = vadd.f32 %v2517_v4, %v2516_v46  ;;  %v2506_v3 = vadd.f32 %v2505_v21, %v2504_v47  ;;  %v3579_v14 = vpop.f32.mrb[64].mxu1 }
 0x2d6   : > { %v2894_v6 = vsel %vm2875_vm9, %v2762_v59, %v2893_v24  ;;  %v2489_v5 = vrot.slane %v2488_v22, 1  ;;  %v2523_v18 = vrot.slane %v2522_v60, 2  ;;  %v2168_v8 = vpop.f32.mrb[65].mxu1  ;;  %v2140_v35 = vadd.f32 %v4358_v11, %v4400_v13 }
 0x2d7   : > { %v2895_v10 = vsel %vm2877_vm10, %v2763_v26, %v2894_v6  ;;  %v2519_v34 = vrot.slane %v2518_v1, 1  ;;  %v2507_v17 = vrot.slane %v2506_v3, 1  ;;  %v3580_v19 = vpop.f32.mrb[66].mxu1  ;;  %v2161_v37 = vadd.f32 %v3575_v38, %v4358_v11 }
 0x2d8   : > { %v2490_v49 = vadd.f32 %v2489_v5, %v2488_v22  ;;  %v2524_v15 = vadd.f32 %v2523_v18, %v2522_v60  ;;  %v2153_v31 = vadd.f32 %v4358_v11, %v2152_v29  ;;  %v4420_v20 = vpop.f32.mrb[67].mxu1  ;;  %v2320_v23 = vmax.f32 %v2140_v35, 0.0 }
 0x2d9   : > { %v2520_v33 = vadd.f32 %v2519_v34, %v2518_v1  ;;  %v2508_v39 = vadd.f32 %v2507_v17, %v2506_v3  ;;  %v2164_v25 = vadd.f32 %v3576_v36, %v4358_v11  ;;  %v2325_v30 = vmax.f32 %v2161_v37, 0.0 }
 0x2da   : > { %v2764_v27 = vmul.f32 0.125, %v2490_v49  ;;  %v2525_v28 = vrot.slane %v2524_v15, 1  ;;  %v2323_v51 = vmax.f32 %v2153_v31, 0.0  ;;  %v2766_v48 = vmul.f32 0.125, %v2502_v16 }
 0x2db   : > { %v4423_v13 = vmul.f32 0.125, %v2520_v33  ;;  %v2509_v53 = vrot.slane %v2320_v23, 4  ;;  %v2326_v56 = vmax.f32 %v2164_v25, 0.0  ;;  %v2767_v29 = vmul.f32 0.125, %v2508_v39 }
 0x2dc   : > { %v2896_v38 = vsel %vm2879_vm11, %v2764_v27, %v2895_v10  ;;  %v2539_v50 = vrot.slane %v2325_v30, 4  ;;  %v2527_v32 = vrot.slane %v2323_v51, 4  ;;  %v2156_v36 = vadd.f32 %v4358_v11, %v4410_v40 }
 0x2dd   : > { %v2897_v58 = vsel %vm2881_vm12, %v2765_v62, %v2896_v38  ;;  %v2510_v52 = vadd.f32 %v2509_v53, %v2320_v23  ;;  %v2545_v41 = vrot.slane %v2326_v56, 4  ;;  %v4429_v54 = vpop.f32.mrb[68].mxu1  ;;  %v2526_v43 = vadd.f32 %v2525_v28, %v2524_v15 }
 0x2de   : > { %v2898_v42 = vsel %vm2883_vm13, %v2766_v48, %v2897_v58  ;;  %v2540_v7 = vadd.f32 %v2539_v50, %v2325_v30  ;;  %v2528_v9 = vadd.f32 %v2527_v32, %v2323_v51  ;;  %v4432_v44 = vpop.f32.mrb[69].mxu1  ;;  %v2324_v46 = vmax.f32 %v2156_v36, 0.0 }
 0x2df   : > { %2944 = vst [vmem:[%s4385_s14 + $0x10] sm:$0xff] %v2898_v42  ;;  %v2511_v45 = vrot.slane %v2510_v52, 2  ;;  %v2546_v12 = vadd.f32 %v2545_v41, %v2326_v56  ;;  %v2177_v47 = vadd.f32 %v3579_v14, %v4358_v11  ;;  %v4436_v55 = vpop.f32.mrb[70].mxu1  ;;  %v2169_v40 = vadd.f32 %v4358_v11, %v2168_v8 }
 0x2e0   : > { %v2541_v63 = vrot.slane %v2540_v7, 2  ;;  %v2529_v57 = vrot.slane %v2528_v9, 2  ;;  %v2180_v0 = vadd.f32 %v3580_v19, %v4358_v11  ;;  %v4440_v59 = vpop.f32.mrb[71].mxu1  ;;  %v2533_v21 = vrot.slane %v2324_v46, 4 }
 0x2e1   : > { %v2512_v2 = vadd.f32 %v2511_v45, %v2510_v52  ;;  %v2547_v4 = vrot.slane %v2546_v12, 2  ;;  %v2329_v61 = vmax.f32 %v2177_v47, 0.0  ;;  %v2327_v60 = vmax.f32 %v2169_v40, 0.0 }
 0x2e2   : > { %v2542_v62 = vadd.f32 %v2541_v63, %v2540_v7  ;;  %v2530_v22 = vadd.f32 %v2529_v57, %v2528_v9  ;;  %v2330_v24 = vmax.f32 %v2180_v0, 0.0  ;;  %v2534_v3 = vadd.f32 %v2533_v21, %v2324_v46 }
 0x2e3   : > { %v2513_v26 = vrot.slane %v2512_v2, 1  ;;  %v2548_v1 = vadd.f32 %v2547_v4, %v2546_v12  ;;  %v2563_v14 = vrot.slane %v2329_v61, 4  ;;  %v2551_v5 = vrot.slane %v2327_v60, 4 }
 0x2e4   : > { %v2543_v6 = vrot.slane %v2542_v62, 1  ;;  %v2531_v16 = vrot.slane %v2530_v22, 1  ;;  %v2569_v18 = vrot.slane %v2330_v24, 4  ;;  %v2535_v34 = vrot.slane %v2534_v3, 2 }
 0x2e5   : > { %v2514_v8 = vadd.f32 %v2513_v26, %v2512_v2  ;;  %v2549_v10 = vrot.slane %v2548_v1, 1  ;;  %v2564_v17 = vadd.f32 %v2563_v14, %v2329_v61  ;;  %v3587_v35 = vpop.f32.mrb[72].mxu1  ;;  %v2552_v15 = vadd.f32 %v2551_v5, %v2327_v60 }
 0x2e6   : > { %v2544_v19 = vadd.f32 %v2543_v6, %v2542_v62  ;;  %v2532_v49 = vadd.f32 %v2531_v16, %v2530_v22  ;;  %v2570_v37 = vadd.f32 %v2569_v18, %v2330_v24  ;;  %v2200_v31 = vpop.f32.mrb[73].mxu1  ;;  %v2770_v33 = vmul.f32 0.125, %v2526_v43 }
 0x2e7   : > { %v2768_v39 = vmul.f32 0.125, %v2514_v8  ;;  %v2536_v23 = vadd.f32 %v2535_v34, %v2534_v3  ;;  %v2565_v25 = vrot.slane %v2564_v17, 2  ;;  %v3588_v27 = vpop.f32.mrb[74].mxu1  ;;  %v2550_v30 = vadd.f32 %v2549_v10, %v2548_v1 }
 0x2e8   : > { %v2771_v28 = vmul.f32 0.125, %v2532_v49  ;;  %v2553_v51 = vrot.slane %v2552_v15, 2  ;;  %v2571_v48 = vrot.slane %v2570_v37, 2  ;;  %v4442_v53 = vpop.f32.mrb[75].mxu1  ;;  %v2773_v38 = vmul.f32 0.125, %v2544_v19 }
 0x2e9   : > { %v2899_v56 = vsel %vm2871_vm5, %v2768_v39, %v2767_v29  ;;  %v2537_v50 = vrot.slane %v2536_v23, 1  ;;  %v2566_v32 = vadd.f32 %v2565_v25, %v2564_v17  ;;  %v2172_v36 = vadd.f32 %v4358_v11, %v4420_v20 }
 0x2ea   : > { %v2900_v58 = vsel %vm2873_vm3, %v4423_v13, %v2899_v56  ;;  %v2554_v52 = vadd.f32 %v2553_v51, %v2552_v15  ;;  %v2572_v41 = vadd.f32 %v2571_v48, %v2570_v37  ;;  %v2193_v9 = vadd.f32 %v4429_v54, %v4358_v11 }
 0x2eb   : > { %v2901_v42 = vsel %vm2875_vm9, %v2770_v33, %v2900_v58  ;;  %v2538_v43 = vadd.f32 %v2537_v50, %v2536_v23  ;;  %v2567_v7 = vrot.slane %v2566_v32, 1  ;;  %v2328_v46 = vmax.f32 %v2172_v36, 0.0 }
 0x2ec   : > { %v2902_v29 = vsel %vm2877_vm10, %v2771_v28, %v2901_v42  ;;  %v2555_v45 = vrot.slane %v2554_v52, 1  ;;  %v2573_v12 = vrot.slane %v2572_v41, 1  ;;  %v2333_v13 = vmax.f32 %v2193_v9, 0.0 }
 0x2ed   : > { %v2772_v47 = vmul.f32 0.125, %v2538_v43  ;;  %v2568_v63 = vadd.f32 %v2567_v7, %v2566_v32  ;;  %v2185_v57 = vadd.f32 %v4358_v11, %v4432_v44  ;;  %v4455_v40 = vpop.f32.mrb[76].mxu1  ;;  %v2774_v20 = vmul.f32 0.125, %v2550_v30 }
 0x2ee   : > { %v2556_v0 = vadd.f32 %v2555_v45, %v2554_v52  ;;  %v2557_v2 = vrot.slane %v2328_v46, 4  ;;  %v2196_v4 = vadd.f32 %v4436_v55, %v4358_v11  ;;  %v4459_v54 = vpop.f32.mrb[77].mxu1  ;;  %v2574_v61 = vadd.f32 %v2573_v12, %v2572_v41 }
 0x2ef   : > { %v2903_v21 = vsel %vm2879_vm11, %v2772_v47, %v2902_v29  ;;  %v2587_v62 = vrot.slane %v2333_v13, 4  ;;  %v2331_v22 = vmax.f32 %v2185_v57, 0.0  ;;  %v4462_v60 = vpop.f32.mrb[78].mxu1  ;;  %v2777_v24 = vmul.f32 0.125, %v2568_v63 }
 0x2f0   : > { %v2904_v44 = vsel %vm2881_vm12, %v2773_v38, %v2903_v21  ;;  %v2775_v26 = vmul.f32 0.125, %v2556_v0  ;;  %v2558_v1 = vadd.f32 %v2557_v2, %v2328_v46  ;;  %v4465_v3 = vpop.f32.mrb[79].mxu1  ;;  %v2334_v16 = vmax.f32 %v2196_v4, 0.0 }
 0x2f1   : > { %v2905_v14 = vsel %vm2883_vm13, %v2774_v20, %v2904_v44  ;;  %v2588_v55 = vadd.f32 %v2587_v62, %v2333_v13  ;;  %v2575_v6 = vrot.slane %v2331_v22, 4  ;;  %v2188_v18 = vadd.f32 %v4358_v11, %v4440_v59 }
 0x2f2   : > { %2945 = vst [vmem:[%s4385_s14 + $0x18] sm:$0xff] %v2905_v14  ;;  %v2559_v5 = vrot.slane %v2558_v1, 2  ;;  %v2209_v8 = vadd.f32 %v3587_v35, %v4358_v11  ;;  %v2201_v10 = vadd.f32 %v4358_v11, %v2200_v31  ;;  %v2593_v19 = vrot.slane %v2334_v16, 4 }
 0x2f3   : > { %v2589_v34 = vrot.slane %v2588_v55, 2  ;;  %v2576_v17 = vadd.f32 %v2575_v6, %v2331_v22  ;;  %v2212_v49 = vadd.f32 %v3588_v27, %v4358_v11  ;;  %v2332_v37 = vmax.f32 %v2188_v18, 0.0 }
 0x2f4   : > { %v2560_v15 = vadd.f32 %v2559_v5, %v2558_v1  ;;  %v2337_v33 = vmax.f32 %v2209_v8, 0.0  ;;  %v2335_v39 = vmax.f32 %v2201_v10, 0.0  ;;  %v2594_v28 = vadd.f32 %v2593_v19, %v2334_v16 }
 0x2f5   : > { %v2590_v23 = vadd.f32 %v2589_v34, %v2588_v55  ;;  %v2577_v25 = vrot.slane %v2576_v17, 2  ;;  %v2338_v30 = vmax.f32 %v2212_v49, 0.0  ;;  %v4474_v51 = vpop.f32.mrb[80].mxu1  ;;  %v2581_v48 = vrot.slane %v2332_v37, 4 }
 0x2f6   : > { %v2561_v59 = vrot.slane %v2560_v15, 1  ;;  %v2611_v35 = vrot.slane %v2337_v33, 4  ;;  %v2599_v56 = vrot.slane %v2335_v39, 4  ;;  %v4476_v31 = vpop.f32.mrb[81].mxu1  ;;  %v2595_v32 = vrot.slane %v2594_v28, 2 }
 0x2f7   : > { %v2591_v38 = vrot.slane %v2590_v23, 1  ;;  %v2578_v50 = vadd.f32 %v2577_v25, %v2576_v17  ;;  %v2617_v27 = vrot.slane %v2338_v30, 4  ;;  %v4478_v58 = vpop.f32.mrb[82].mxu1  ;;  %v2582_v41 = vadd.f32 %v2581_v48, %v2332_v37 }
 0x2f8   : > { %v2562_v52 = vadd.f32 %v2561_v59, %v2560_v15  ;;  %v2612_v36 = vadd.f32 %v2611_v35, %v2337_v33  ;;  %v2600_v42 = vadd.f32 %v2599_v56, %v2335_v39  ;;  %v4480_v43 = vpop.f32.mrb[83].mxu1  ;;  %v2778_v7 = vmul.f32 0.125, %v2574_v61 }
 0x2f9   : > { %v2579_v9 = vrot.slane %v2578_v50, 1  ;;  %v2596_v29 = vadd.f32 %v2595_v32, %v2594_v28  ;;  %v2618_v45 = vadd.f32 %v2617_v27, %v2338_v30  ;;  %v2583_v46 = vrot.slane %v2582_v41, 2 }
 0x2fa   : > { %v2776_v12 = vmul.f32 0.125, %v2562_v52  ;;  %v2613_v47 = vrot.slane %v2612_v36, 2  ;;  %v2601_v63 = vrot.slane %v2600_v42, 2  ;;  %v2592_v13 = vadd.f32 %v2591_v38, %v2590_v23 }
 0x2fb   : > { %v2580_v57 = vadd.f32 %v2579_v9, %v2578_v50  ;;  %v2597_v20 = vrot.slane %v2596_v29, 1  ;;  %v2619_v0 = vrot.slane %v2618_v45, 2  ;;  %v2584_v4 = vadd.f32 %v2583_v46, %v2582_v41 }
 0x2fc   : > { %v2906_v2 = vsel %vm2871_vm5, %v2776_v12, %v2775_v26  ;;  %v2614_v21 = vadd.f32 %v2613_v47, %v2612_v36  ;;  %v2602_v62 = vadd.f32 %v2601_v63, %v2600_v42  ;;  %v2204_v26 = vadd.f32 %v4358_v11, %v4442_v53 }
 0x2fd   : > { %v2907_v22 = vsel %vm2873_vm3, %v2777_v24, %v2906_v2  ;;  %v2779_v44 = vmul.f32 0.125, %v2580_v57  ;;  %v2598_v61 = vadd.f32 %v2597_v20, %v2596_v29  ;;  %v4484_v1 = vpop.f32.mrb[84].mxu1  ;;  %v2585_v55 = vrot.slane %v2584_v4, 1 }
 0x2fe   : > { %v2908_v14 = vsel %vm2875_vm9, %v2778_v7, %v2907_v22  ;;  %v2615_v6 = vrot.slane %v2614_v21, 1  ;;  %v2620_v16 = vadd.f32 %v2619_v0, %v2618_v45  ;;  %v4487_v5 = vpop.f32.mrb[85].mxu1  ;;  %v2603_v8 = vrot.slane %v2602_v62, 1 }
 0x2ff   : > { %v2909_v18 = vsel %vm2877_vm10, %v2779_v44, %v2908_v14  ;;  %v4492_v10 = vpop.f32.mrb[86].mxu1  ;;  %v2781_v24 = vmul.f32 0.125, %v2592_v13  ;;  %v2586_v34 = vadd.f32 %v2585_v55, %v2584_v4  ;;  %v2225_v17 = vadd.f32 %v4455_v40, %v4358_v11 }
 0x300   : > { %v4496_v19 = vpop.f32.mrb[87].mxu1  ;;  %v2782_v49 = vmul.f32 0.125, %v2598_v61  ;;  %v2336_v15 = vmax.f32 %v2204_v26, 0.0  ;;  %v2217_v37 = vadd.f32 %v4358_v11, %v4459_v54  ;;  %v2228_v33 = vadd.f32 %v4462_v60, %v4358_v11 }
 0x301   : > { %v2780_v39 = vmul.f32 0.125, %v2586_v34  ;;  %v2616_v23 = vadd.f32 %v2615_v6, %v2614_v21  ;;  %v2621_v53 = vrot.slane %v2620_v16, 1  ;;  %v2341_v25 = vmax.f32 %v2225_v17, 0.0 }
 0x302   : > { %v2604_v28 = vadd.f32 %v2603_v8, %v2602_v62  ;;  %v2605_v30 = vrot.slane %v2336_v15, 4  ;;  %v2339_v59 = vmax.f32 %v2217_v37, 0.0  ;;  %v2342_v48 = vmax.f32 %v2228_v33, 0.0 }
 0x303   : > { %v2910_v40 = vsel %vm2879_vm11, %v2780_v39, %v2909_v18  ;;  %v2635_v35 = vrot.slane %v2341_v25, 4  ;;  %v2220_v56 = vadd.f32 %v4358_v11, %v4465_v3  ;;  %v2241_v54 = vadd.f32 %v4474_v51, %v4358_v11  ;;  %v4517_v11 = vld [vmem:[%s4642_s5] ss:$0 sm:$0xff] }
 0x304   : > { %v2911_v60 = vsel %vm2881_vm12, %v2781_v24, %v2910_v40  ;;  %v2606_v38 = vadd.f32 %v2605_v30, %v2336_v15  ;;  %v2623_v50 = vrot.slane %v2339_v59, 4  ;;  %v2641_v32 = vrot.slane %v2342_v48, 4 }
 0x305   : > { %v4508_v27 = vpop.f32.mrb[88].mxu1  ;;  %v2912_v52 = vsel %vm2883_vm13, %v2782_v49, %v2911_v60  ;;  %v2636_v41 = vadd.f32 %v2635_v35, %v2341_v25  ;;  %v2340_v36 = vmax.f32 %v2220_v56, 0.0  ;;  %v2345_v42 = vmax.f32 %v2241_v54, 0.0 }
 0x306   : > { %v4511_v7 = vpop.f32.mrb[89].mxu1  ;;  %2946 = vst [vmem:[%s4385_s14 + $0x20] sm:$0xff] %v2912_v52  ;;  %v2607_v9 = vrot.slane %v2606_v38, 2  ;;  %v2624_v3 = vadd.f32 %v2623_v50, %v2339_v59  ;;  %v2642_v29 = vadd.f32 %v2641_v32, %v2342_v48  ;;  %v2233_v51 = vadd.f32 %v4517_v11, %v4476_v31 }
 0x307   : > { %v4521_v45 = vpop.f32.mrb[90].mxu1  ;;  %v2637_v12 = vrot.slane %v2636_v41, 2  ;;  %v2629_v46 = vrot.slane %v2340_v36, 4  ;;  %v2659_v47 = vrot.slane %v2345_v42, 4  ;;  %v2244_v63 = vadd.f32 %v4517_v11, %v4478_v58 }
 0x308   : > { %v4525_v13 = vpop.f32.mrb[91].mxu1  ;;  %v2608_v57 = vadd.f32 %v2607_v9, %v2606_v38  ;;  %v2625_v20 = vrot.slane %v2624_v3, 2  ;;  %v2643_v0 = vrot.slane %v2642_v29, 2  ;;  %v2343_v2 = vmax.f32 %v2233_v51, 0.0 }
 0x309   : > { %v2638_v4 = vadd.f32 %v2637_v12, %v2636_v41  ;;  %v2630_v21 = vadd.f32 %v2629_v46, %v2340_v36  ;;  %v2660_v62 = vadd.f32 %v2659_v47, %v2345_v42  ;;  %v2346_v22 = vmax.f32 %v2244_v63, 0.0 }
 0x30a   : > { %v2609_v44 = vrot.slane %v2608_v57, 1  ;;  %v2626_v31 = vadd.f32 %v2625_v20, %v2624_v3  ;;  %v2644_v61 = vadd.f32 %v2643_v0, %v2642_v29  ;;  %v2647_v14 = vrot.slane %v2343_v2, 4 }
 0x30b   : > { %v2622_v55 = vadd.f32 %v2621_v53, %v2620_v16  ;;  %v2639_v6 = vrot.slane %v2638_v4, 1  ;;  %v2631_v18 = vrot.slane %v2630_v21, 2  ;;  %v2665_v8 = vrot.slane %v2346_v22, 4 }
 0x30c   : > { %v2610_v26 = vadd.f32 %v2609_v44, %v2608_v57  ;;  %v2627_v58 = vrot.slane %v2626_v31, 1  ;;  %v2661_v24 = vrot.slane %v2660_v62, 2  ;;  %v2648_v34 = vadd.f32 %v2647_v14, %v2343_v2 }
 0x30d   : > { %v4527_v17 = vpop.f32.mrb[92].mxu1  ;;  %v2645_v49 = vrot.slane %v2644_v61, 1  ;;  %v2632_v15 = vadd.f32 %v2631_v18, %v2630_v21  ;;  %v2666_v37 = vadd.f32 %v2665_v8, %v2346_v22  ;;  %v2783_v39 = vmul.f32 0.125, %v2604_v28 }
 0x30e   : > { %v4529_v33 = vpop.f32.mrb[93].mxu1  ;;  %v2784_v25 = vmul.f32 0.125, %v2610_v26  ;;  %v2628_v30 = vadd.f32 %v2627_v58, %v2626_v31  ;;  %v2649_v59 = vrot.slane %v2648_v34, 2  ;;  %v2785_v16 = vmul.f32 0.125, %v2616_v23 }
 0x30f   : > { %v4531_v48 = vpop.f32.mrb[94].mxu1  ;;  %v2640_v53 = vadd.f32 %v2639_v6, %v2638_v4  ;;  %v2633_v40 = vrot.slane %v2632_v15, 1  ;;  %v2667_v35 = vrot.slane %v2666_v37, 2  ;;  %v2786_v54 = vmul.f32 0.125, %v2622_v55 }
 0x310   : > { %v4533_v56 = vpop.f32.mrb[95].mxu1  ;;  %v2913_v60 = vsel %vm2871_vm5, %v2784_v25, %v2783_v39  ;;  %v2787_v38 = vmul.f32 0.125, %v2628_v30  ;;  %v2662_v50 = vadd.f32 %v2661_v24, %v2660_v62  ;;  %v2646_v52 = vadd.f32 %v2645_v49, %v2644_v61 }
 0x311   : > { %v2914_v32 = vsel %vm2873_vm3, %v2785_v16, %v2913_v60  ;;  %v2634_v28 = vadd.f32 %v2633_v40, %v2632_v15  ;;  %v2650_v36 = vadd.f32 %v2649_v59, %v2648_v34  ;;  %v2236_v23 = vadd.f32 %v4517_v11, %v4480_v43 }
 0x312   : > { %v2915_v41 = vsel %vm2875_vm9, %v2786_v54, %v2914_v32  ;;  %v2257_v42 = vadd.f32 %v4517_v11, %v4484_v1  ;;  %v2789_v9 = vmul.f32 0.125, %v2640_v53  ;;  %v2668_v51 = vadd.f32 %v2667_v35, %v2666_v37 }
 0x313   : > { %v2916_v3 = vsel %vm2877_vm10, %v2787_v38, %v2915_v41  ;;  %v2788_v29 = vmul.f32 0.125, %v2634_v28  ;;  %v2663_v12 = vrot.slane %v2662_v50, 1  ;;  %v2344_v46 = vmax.f32 %v2236_v23, 0.0 }
 0x314   : > { %v2349_v47 = vmax.f32 %v2257_v42, 0.0  ;;  %v2249_v63 = vadd.f32 %v4517_v11, %v4487_v5  ;;  %v2790_v57 = vmul.f32 0.125, %v2646_v52  ;;  %v2260_v43 = vadd.f32 %v4517_v11, %v4492_v10 }
 0x315   : > { %v2917_v20 = vsel %vm2879_vm11, %v2788_v29, %v2916_v3  ;;  %v2252_v1 = vadd.f32 %v4517_v11, %v4496_v19  ;;  %v2651_v2 = vrot.slane %v2650_v36, 1  ;;  %v2653_v4 = vrot.slane %v2344_v46, 4 }
 0x316   : > { %v2918_v0 = vsel %vm2881_vm12, %v2789_v9, %v2917_v20  ;;  %v2683_v21 = vrot.slane %v2349_v47, 4  ;;  %v2669_v22 = vrot.slane %v2668_v51, 1  ;;  %v2347_v44 = vmax.f32 %v2249_v63, 0.0 }
 0x317   : > { %v2919_v62 = vsel %vm2883_vm13, %v2790_v57, %v2918_v0  ;;  %v2350_v31 = vmax.f32 %v2260_v43, 0.0  ;;  %v2654_v5 = vadd.f32 %v2653_v4, %v2344_v46  ;;  %v2348_v14 = vmax.f32 %v2252_v1, 0.0 }
 0x318   : > { %2947 = vst [vmem:[%s4385_s14 + $0x28] sm:$0xff] %v2919_v62  ;;  %v2684_v61 = vadd.f32 %v2683_v21, %v2349_v47  ;;  %v2273_v10 = vadd.f32 %v4517_v11, %v4508_v27  ;;  %v2671_v55 = vrot.slane %v2347_v44, 4  ;;  %v2265_v19 = vadd.f32 %v4517_v11, %v4511_v7 }
 0x319   : > { %v2689_v6 = vrot.slane %v2350_v31, 4  ;;  %v2276_v18 = vadd.f32 %v4517_v11, %v4521_v45  ;;  %v2655_v8 = vrot.slane %v2654_v5, 2  ;;  %v2677_v58 = vrot.slane %v2348_v14, 4 }
 0x31a   : > { %v2685_v26 = vrot.slane %v2684_v61, 2  ;;  %v2353_v24 = vmax.f32 %v2273_v10, 0.0  ;;  %v2672_v34 = vadd.f32 %v2671_v55, %v2347_v44  ;;  %v2351_v15 = vmax.f32 %v2265_v19, 0.0 }
 0x31b   : > { %v2690_v49 = vadd.f32 %v2689_v6, %v2350_v31  ;;  %v2354_v37 = vmax.f32 %v2276_v18, 0.0  ;;  %v2664_v39 = vadd.f32 %v2663_v12, %v2662_v50  ;;  %v2656_v25 = vadd.f32 %v2655_v8, %v2654_v5 }
 0x31c   : > { %v2686_v30 = vadd.f32 %v2685_v26, %v2684_v61  ;;  %v2678_v27 = vadd.f32 %v2677_v58, %v2348_v14  ;;  %v2652_v59 = vadd.f32 %v2651_v2, %v2650_v36  ;;  %v2673_v16 = vrot.slane %v2672_v34, 2 }
 0x31d   : > { %v2691_v53 = vrot.slane %v2690_v49, 2  ;;  %v2695_v40 = vrot.slane %v2351_v15, 4  ;;  %v2657_v7 = vrot.slane %v2656_v25, 1  ;;  %v2707_v54 = vrot.slane %v2353_v24, 4 }
 0x31e   : > { %v2679_v35 = vrot.slane %v2678_v27, 2  ;;  %v2713_v45 = vrot.slane %v2354_v37, 4  ;;  %v2670_v60 = vadd.f32 %v2669_v22, %v2668_v51  ;;  %v2687_v38 = vrot.slane %v2686_v30, 1 }
 0x31f   : > { %v2674_v32 = vadd.f32 %v2673_v16, %v2672_v34  ;;  %v2692_v52 = vadd.f32 %v2691_v53, %v2690_v49  ;;  %v2658_v28 = vadd.f32 %v2657_v7, %v2656_v25  ;;  %v2791_v23 = vmul.f32 0.125, %v2652_v59 }
 0x320   : > { %v2680_v41 = vadd.f32 %v2679_v35, %v2678_v27  ;;  %v2696_v9 = vadd.f32 %v2695_v40, %v2351_v15  ;;  %v2708_v36 = vadd.f32 %v2707_v54, %v2353_v24  ;;  %v2714_v12 = vadd.f32 %v2713_v45, %v2354_v37 }
 0x321   : > { %v2675_v42 = vrot.slane %v2674_v32, 1  ;;  %v2693_v50 = vrot.slane %v2692_v52, 1  ;;  %v2792_v3 = vmul.f32 0.125, %v2658_v28  ;;  %v2793_v46 = vmul.f32 0.125, %v2664_v39 }
 0x322   : > { %v2681_v29 = vrot.slane %v2680_v41, 1  ;;  %v2794_v47 = vmul.f32 0.125, %v2670_v60  ;;  %v2688_v63 = vadd.f32 %v2687_v38, %v2686_v30  ;;  %v2268_v1 = vadd.f32 %v4517_v11, %v4525_v13 }
 0x323   : > { %v2676_v57 = vadd.f32 %v2675_v42, %v2674_v32  ;;  %v2920_v20 = vsel %vm2871_vm5, %v2792_v3, %v2791_v23  ;;  %v2694_v51 = vadd.f32 %v2693_v50, %v2692_v52  ;;  %v2697_v4 = vrot.slane %v2696_v9, 2 }
 0x324   : > { %v2682_v43 = vadd.f32 %v2681_v29, %v2680_v41  ;;  %v2921_v0 = vsel %vm2873_vm3, %v2793_v46, %v2920_v20  ;;  %v2709_v22 = vrot.slane %v2708_v36, 2  ;;  %v2715_v44 = vrot.slane %v2714_v12, 2 }
 0x325   : > { %v2795_v2 = vmul.f32 0.125, %v2676_v57  ;;  %v2922_v21 = vsel %vm2875_vm9, %v2794_v47, %v2921_v0  ;;  %v2797_v31 = vmul.f32 0.125, %v2688_v63  ;;  %v2352_v61 = vmax.f32 %v2268_v1, 0.0 }
 0x326   : > { %v2796_v62 = vmul.f32 0.125, %v2682_v43  ;;  %v2289_v14 = vadd.f32 %v4517_v11, %v4527_v17  ;;  %v2798_v10 = vmul.f32 0.125, %v2694_v51  ;;  %v2281_v55 = vadd.f32 %v4517_v11, %v4529_v33 }
 0x327   : > { %v2923_v5 = vsel %vm2877_vm10, %v2795_v2, %v2922_v21  ;;  %v2698_v19 = vadd.f32 %v2697_v4, %v2696_v9  ;;  %v2701_v18 = vrot.slane %v2352_v61, 4  ;;  %v2710_v58 = vadd.f32 %v2709_v22, %v2708_v36 }
 0x328   : > { %v2924_v13 = vsel %vm2879_vm11, %v2796_v62, %v2923_v5  ;;  %v2357_v8 = vmax.f32 %v2289_v14, 0.0  ;;  %v2355_v24 = vmax.f32 %v2281_v55, 0.0  ;;  %v2292_v34 = vadd.f32 %v4517_v11, %v4531_v48 }
 0x329   : > { %v2925_v6 = vsel %vm2881_vm12, %v2797_v31, %v2924_v13  ;;  %v2716_v17 = vadd.f32 %v2715_v44, %v2714_v12  ;;  %v2702_v49 = vadd.f32 %v2701_v18, %v2352_v61  ;;  %v2284_v37 = vadd.f32 %v4517_v11, %v4533_v56 }
 0x32a   : > { %v2926_v26 = vsel %vm2883_vm13, %v2798_v10, %v2925_v6  ;;  %v2731_v15 = vrot.slane %v2357_v8, 4  ;;  %v2719_v33 = vrot.slane %v2355_v24, 4  ;;  %v2358_v39 = vmax.f32 %v2292_v34, 0.0 }
 0x32b   : > { %2948 = vst [vmem:[%s4385_s14 + $0x30] sm:$0xff] %v2926_v26  ;;  %v2699_v25 = vrot.slane %v2698_v19, 1  ;;  %v2703_v30 = vrot.slane %v2702_v49, 2  ;;  %v2356_v59 = vmax.f32 %v2284_v37, 0.0  ;;  %v2711_v16 = vrot.slane %v2710_v58, 1 }
 0x32c   : > { %v2732_v27 = vadd.f32 %v2731_v15, %v2357_v8  ;;  %v2720_v53 = vadd.f32 %v2719_v33, %v2355_v24  ;;  %v2737_v40 = vrot.slane %v2358_v39, 4  ;;  %v2717_v7 = vrot.slane %v2716_v17, 1 }
 0x32d   : > { %v2704_v35 = vadd.f32 %v2703_v30, %v2702_v49  ;;  %v2725_v48 = vrot.slane %v2356_v59, 4  ;;  %v2700_v38 = vadd.f32 %v2699_v25, %v2698_v19  ;;  %v2712_v11 = vadd.f32 %v2711_v16, %v2710_v58 }
 0x32e   : > { %v2733_v54 = vrot.slane %v2732_v27, 2  ;;  %v2721_v45 = vrot.slane %v2720_v53, 2  ;;  %v2738_v60 = vadd.f32 %v2737_v40, %v2358_v39  ;;  %v2718_v23 = vadd.f32 %v2717_v7, %v2716_v17 }
 0x32f   : > { %v2705_v32 = vrot.slane %v2704_v35, 1  ;;  %v2726_v28 = vadd.f32 %v2725_v48, %v2356_v59  ;;  %v2799_v36 = vmul.f32 0.125, %v2700_v38  ;;  %v2801_v47 = vmul.f32 0.125, %v2712_v11 }
 0x330   : > { %v2734_v52 = vadd.f32 %v2733_v54, %v2732_v27  ;;  %v2722_v56 = vadd.f32 %v2721_v45, %v2720_v53  ;;  %v2739_v41 = vrot.slane %v2738_v60, 2  ;;  %v2802_v20 = vmul.f32 0.125, %v2718_v23 }
 0x331   : > { %v2706_v42 = vadd.f32 %v2705_v32, %v2704_v35  ;;  %v2727_v50 = vrot.slane %v2726_v28, 2 }
 0x332   : > { %v2735_v9 = vrot.slane %v2734_v52, 1  ;;  %v2723_v3 = vrot.slane %v2722_v56, 1  ;;  %v2740_v29 = vadd.f32 %v2739_v41, %v2738_v60 }
 0x333   : > { %v2800_v12 = vmul.f32 0.125, %v2706_v42  ;;  %v2728_v46 = vadd.f32 %v2727_v50, %v2726_v28 }
 0x334   : > { %v2724_v63 = vadd.f32 %v2723_v3, %v2722_v56  ;;  %v2741_v57 = vrot.slane %v2740_v29, 1  ;;  %v2736_v0 = vadd.f32 %v2735_v9, %v2734_v52 }
 0x335   : > { %v2927_v51 = vsel %vm2871_vm5, %v2800_v12, %v2799_v36  ;;  %v2729_v43 = vrot.slane %v2728_v46, 1 }
 0x336   : > { %v2928_v1 = vsel %vm2873_vm3, %v2801_v47, %v2927_v51  ;;  %v2803_v2 = vmul.f32 0.125, %v2724_v63  ;;  %v2742_v21 = vadd.f32 %v2741_v57, %v2740_v29  ;;  %v2805_v31 = vmul.f32 0.125, %v2736_v0 }
 0x337   : > { %v2929_v4 = vsel %vm2875_vm9, %v2802_v20, %v2928_v1  ;;  %v2730_v62 = vadd.f32 %v2729_v43, %v2728_v46 }
 0x338   : > { %v2930_v22 = vsel %vm2877_vm10, %v2803_v2, %v2929_v4  ;;  %v2806_v5 = vmul.f32 0.125, %v2742_v21 }
 0x339   : > { %v2804_v44 = vmul.f32 0.125, %v2730_v62 }
 0x33b   : > { %v2931_v61 = vsel %vm2879_vm11, %v2804_v44, %v2930_v22 }
 0x33c   : > { %v2932_v14 = vsel %vm2881_vm12, %v2805_v31, %v2931_v61 }
 0x33d   : > { %v2933_v10 = vsel %vm2883_vm13, %v2806_v5, %v2932_v14 }
 0x33e   : > { %2949 = vst [vmem:[%s4385_s14 + $0x38] sm:$0xff] %v2933_v10 }
 0x33f   : > { %3778 = shalt.err (!%p3775_p3)
}
 0x340   : > { %s3779_s11 = scalar_lea.hbm %s4587_s28, 1024  ;;  %s3783_s14 = scalar_lea.hbm %s4643_s6, 2048 }
 0x341   : > { %p3780_p4 = scmp.ne.s32.totalorder %s4587_s28, %s3779_s11  ;;  %p3784_p9 = scmp.lt.u32.totalorder %s4587_s28, %s4643_s6 }
 0x342   : > { %p3785_p10 = scmp.lt.u32.totalorder %s3783_s14, %s3779_s11  ;;  %p3787_p12 = scmp.lt.u32.totalorder %s3779_s11, %s4587_s28 }
 0x343   : > { %p3781_p7 = pnand %p3780_p4, %p3907_p5 }
 0x344   : > { %p3786_p11 = por %p3785_p10, %p3784_p9 }
 0x345   : > { %p3782_p8 = pneg %p3781_p7 }
 0x346   : > { %p3788_p13 = por %p3787_p12, %p3786_p11 }
 0x348   : > { %p3789_p0 = pnand %p3788_p13, %p3782_p8 }
 0x34a   : > { %3792 = shalt.err (!%p3789_p0)
}
 0x34b   : > { %s3832_s18 = smov 128   ;;  %s3833_s20 = smov 8  }
 0x34c   : > { %3677 = dma.vmem_to_hbm [thread:$0]  (%p3907_p5), %s4589_s19, 1024, %s4587_s28, %s4596_s25, %s3832_s18, %s3832_s18, %s3833_s20  }
 0x34d PF: > { %p3683_p1 = scmp.ge.s32.totalorder %s3827_s24, 2  ;;  %s2979_s26 = sand.u32 1, %s3815_s21  }
 0x34e   : > { %s2980_s29 = scalar_lea.sflag [#allocation3], %s2979_s26 }
 0x34f   : > { %p3680_p2 = pnand %p3683_p1, %p3911_p6 }
 0x351   : > { %3810 = dma.done.wait (!%p3680_p2), %s2980_s29, 1024  }
 0x352   : > { %3812 = vsyncadd (!%p3680_p2), %s2980_s29, 4294966272  ;;  %p16_p3 = scmp.ge.s32.totalorder %s3894_s27, 4   ;;  %s4646_s21 = smov %s3819_s22 }
 0x353   : > { %s4647_s22 = smov %s3823_s23  ;;  %s4648_s23 = smov %s3905_s30 }
 0x354   : > { %s4649_s24 = smov %s3894_s27  ;;  %18 = sbr.rel (!%p16_p3) target bundleno = 3 (0x3), region = 82 }
 0x35b   :  { %2985 = vsyncpa [#allocation3], 1 }
 0x35c   :  { %2987 = vsyncpa [#allocation3 + $0x1], 1 }

</bundles_post_ra>
